<compile_context>
chip_gen: v7x
topology: tpu7x:2x2x1
jax: 0.10.0
libtpu: 0.0.40
codegen_flags: <defaults>
</compile_context>

<pallas_src>
import functools
import math

import jax
import jax.numpy as jnp
from jax.experimental import pallas as pl
from jax.experimental.pallas import tpu as pltpu

# ----------------------------- configuration --------------------------------
BATCH = 2
IMG_DIM = 512        # config['image-model']['dim']
COMMON_DIM = 1024    # config['matching']['common-space-dim']


# ============================== Pallas kernel ================================

def _image_extractor_kernel(x_ref, w1_ref, b1_ref, w2_ref, b2_ref, o_ref):
    """Fused MLP tile: o = relu(x @ W1 + b1) @ W2 + b2.

    One row-tile of x lives in VMEM; both weights / biases are fully resident.
    The hidden activation exists only in vregs/VMEM — no HBM traffic between
    the two linears.
    """
    x = x_ref[...]                                                    # (tm, D_in)
    h = jnp.dot(x, w1_ref[...], preferred_element_type=jnp.float32)   # MXU, f32 acc
    h = jnp.maximum(h + b1_ref[...], 0.0)                             # bias + ReLU (VPU)
    y = jnp.dot(h, w2_ref[...], preferred_element_type=jnp.float32)   # MXU, f32 acc
    o_ref[...] = (y + b2_ref[...]).astype(o_ref.dtype)                # lane-dense store


def image_extractor_forward(img_feature, params, *, block_m=256):
    """ImageExtractorModel.forward(img_feature) -> (M, common_dim)."""
    M, d_in = img_feature.shape
    d_hidden = params["w1"].shape[1]
    d_out = params["w2"].shape[1]

    # Row tiling:
    #   * tiny batches -> one block equal to the full row extent (allowed by the
    #     (8,128) rule because it equals the array dim), single grid step;
    #   * large batches -> block_m-row tiles; Pallas masks the ragged last tile.
    if M <= block_m:
        tm = M
    else:
        tm = block_m
    grid = (pl.cdiv(M, tm),)

    return pl.pallas_call(
        _image_extractor_kernel,
        out_shape=jax.ShapeDtypeStruct((M, d_out), jnp.float32),
        grid=grid,
        in_specs=[
            pl.BlockSpec((tm, d_in), lambda i: (i, 0)),         # x: row tile
            pl.BlockSpec((d_in, d_hidden), lambda i: (0, 0)),   # W1: VMEM-resident
            pl.BlockSpec((1, d_hidden), lambda i: (0, 0)),      # b1: VMEM-resident
            pl.BlockSpec((d_hidden, d_out), lambda i: (0, 0)),  # W2: VMEM-resident
            pl.BlockSpec((1, d_out), lambda i: (0, 0)),         # b2: VMEM-resident
        ],
        out_specs=pl.BlockSpec((tm, d_out), lambda i: (i, 0)),
        compiler_params=pltpu.CompilerParams(
            dimension_semantics=("parallel",),                  # shard rows across cores (v7x)
        ),
        cost_estimate=pl.CostEstimate(
            flops=2 * M * d_in * d_hidden + 2 * M * d_hidden * d_out,
            transcendentals=0,
            bytes_accessed=4 * (M * d_in + d_in * d_hidden + d_hidden
                                + d_hidden * d_out + d_out + M * d_out),
        ),
    )(
        img_feature,
        params["w1"], params["b1"].reshape(1, d_hidden),
        params["w2"], params["b2"].reshape(1, d_out),
    )


# ============================ parameter construction =========================

def init_linear(key, d_in, d_out):
    """PyTorch nn.Linear default init; weight stored as (in, out) so y = x @ W + b."""
    kw, kb = jax.random.split(key)
    s = 1.0 / math.sqrt(d_in)
    return (jax.random.uniform(kw, (d_in, d_out), jnp.float32, -s, s),
            jax.random.uniform(kb, (d_out,), jnp.float32, -s, s))


def init_params(key):
    k1, k2 = jax.random.split(key)
    w1, b1 = init_linear(k1, IMG_DIM, IMG_DIM)
    w2, b2 = init_linear(k2, IMG_DIM, COMMON_DIM)
    return {"w1": w1, "b1": b1, "w2": w2, "b2": b2}


# =================================== main ====================================

if __name__ == "__main__":
    root = jax.random.PRNGKey(0)
    pkey, xkey = jax.random.split(root)
    params = init_params(pkey)
    img_feature = jax.random.normal(xkey, (BATCH, IMG_DIM), jnp.float32)

    feat = jax.jit(functools.partial(image_extractor_forward, params=params))(img_feature)
    jax.block_until_ready(feat)

    # Pure-JAX reference of the same forward (Linear -> ReLU -> Linear).
    ref = jnp.maximum(img_feature @ params["w1"] + params["b1"], 0.0) @ params["w2"] + params["b2"]

    assert feat.shape == (BATCH, COMMON_DIM)
    assert bool(jnp.all(jnp.isfinite(feat)))
    assert bool(jnp.allclose(feat, ref, rtol=5e-3, atol=5e-3)), "kernel output mismatch vs reference"
    print("KERNEL_OK")
</pallas_src>

<mosaic_0001>
module attributes {stable_mosaic.version = 11 : i64} {
  func.func @_image_extractor_kernel(%arg0: i32, %arg1: memref<2x512xf32, #tpu.memory_space<vmem>>, %arg2: memref<512x512xf32, #tpu.memory_space<vmem>>, %arg3: memref<1x512xf32, #tpu.memory_space<vmem>>, %arg4: memref<512x1024xf32, #tpu.memory_space<vmem>>, %arg5: memref<1x1024xf32, #tpu.memory_space<vmem>>, %arg6: memref<2x1024xf32, #tpu.memory_space<vmem>>) attributes {dimension_semantics = [#tpu.dimension_semantics<parallel>], iteration_bounds = array<i64: 1>, scalar_prefetch = 0 : i64, scratch_operands = 0 : i64, tpu.core_type = #tpu.core_type<tc>, window_params = [{transform_indices = @transform_0, window_bounds = array<i64: 2, 512>}, {pipeline_mode = #tpu.pipeline_mode<synchronous>, transform_indices = @transform_1, window_bounds = array<i64: 512, 512>}, {pipeline_mode = #tpu.pipeline_mode<synchronous>, transform_indices = @transform_2, window_bounds = array<i64: 1, 512>}, {pipeline_mode = #tpu.pipeline_mode<synchronous>, transform_indices = @transform_3, window_bounds = array<i64: 512, 1024>}, {pipeline_mode = #tpu.pipeline_mode<synchronous>, transform_indices = @transform_4, window_bounds = array<i64: 1, 1024>}, {transform_indices = @transform_5, window_bounds = array<i64: 2, 1024>}]} {
    %c0 = arith.constant 0 : index
    %c0_0 = arith.constant 0 : index
    %0 = vector.load %arg1[%c0, %c0_0] : memref<2x512xf32, #tpu.memory_space<vmem>>, vector<2x512xf32>
    %c0_1 = arith.constant 0 : index
    %c0_2 = arith.constant 0 : index
    %1 = vector.load %arg2[%c0_1, %c0_2] : memref<512x512xf32, #tpu.memory_space<vmem>>, vector<512x512xf32>
    %cst = arith.constant dense<0.000000e+00> : vector<2x512xf32>
    %2 = tpu.matmul %0, %1, %cst {dimension_numbers = #tpu.dot_dimension_numbers<[1], [0], [0], [1], [0, 0, 1, 1], [], []>} : vector<2x512xf32>, vector<512x512xf32>, vector<2x512xf32> -> vector<2x512xf32>
    %c0_3 = arith.constant 0 : index
    %c0_4 = arith.constant 0 : index
    %3 = vector.load %arg3[%c0_3, %c0_4] : memref<1x512xf32, #tpu.memory_space<vmem>>, vector<1x512xf32>
    %4 = vector.broadcast %3 : vector<1x512xf32> to vector<2x512xf32>
    %5 = arith.addf %2, %4 : vector<2x512xf32>
    %cst_5 = arith.constant 0.000000e+00 : f32
    %6 = vector.broadcast %cst_5 : f32 to vector<2x512xf32>
    %7 = arith.maximumf %5, %6 : vector<2x512xf32>
    %c0_6 = arith.constant 0 : index
    %c0_7 = arith.constant 0 : index
    %8 = vector.load %arg4[%c0_6, %c0_7] : memref<512x1024xf32, #tpu.memory_space<vmem>>, vector<512x1024xf32>
    %cst_8 = arith.constant dense<0.000000e+00> : vector<2x1024xf32>
    %9 = tpu.matmul %7, %8, %cst_8 {dimension_numbers = #tpu.dot_dimension_numbers<[1], [0], [0], [1], [0, 0, 1, 1], [], []>} : vector<2x512xf32>, vector<512x1024xf32>, vector<2x1024xf32> -> vector<2x1024xf32>
    %c0_9 = arith.constant 0 : index
    %c0_10 = arith.constant 0 : index
    %10 = vector.load %arg5[%c0_9, %c0_10] : memref<1x1024xf32, #tpu.memory_space<vmem>>, vector<1x1024xf32>
    %11 = vector.broadcast %10 : vector<1x1024xf32> to vector<2x1024xf32>
    %12 = arith.addf %9, %11 : vector<2x1024xf32>
    %c0_11 = arith.constant 0 : index
    %c0_12 = arith.constant 0 : index
    %13 = vector.load %arg6[%c0_11, %c0_12] : memref<2x1024xf32, #tpu.memory_space<vmem>>, vector<2x1024xf32>
    tpu.vector_store %arg6[%c0_11, %c0_12], %12 {strides = array<i32>} : memref<2x1024xf32, #tpu.memory_space<vmem>>, vector<2x1024xf32>,
    return
  }
  func.func @transform_0(%arg0: i32) -> (i32, i32) {
    %c0_i32 = arith.constant 0 : i32
    %c0_i32_0 = arith.constant 0 : i32
    return %arg0, %c0_i32 : i32, i32
  }
  func.func @transform_1(%arg0: i32) -> (i32, i32) {
    %c0_i32 = arith.constant 0 : i32
    %c0_i32_0 = arith.constant 0 : i32
    %c0_i32_1 = arith.constant 0 : i32
    return %c0_i32, %c0_i32_0 : i32, i32
  }
  func.func @transform_2(%arg0: i32) -> (i32, i32) {
    %c0_i32 = arith.constant 0 : i32
    %c0_i32_0 = arith.constant 0 : i32
    %c0_i32_1 = arith.constant 0 : i32
    return %c0_i32, %c0_i32_0 : i32, i32
  }
  func.func @transform_3(%arg0: i32) -> (i32, i32) {
    %c0_i32 = arith.constant 0 : i32
    %c0_i32_0 = arith.constant 0 : i32
    %c0_i32_1 = arith.constant 0 : i32
    return %c0_i32, %c0_i32_0 : i32, i32
  }
  func.func @transform_4(%arg0: i32) -> (i32, i32) {
    %c0_i32 = arith.constant 0 : i32
    %c0_i32_0 = arith.constant 0 : i32
    %c0_i32_1 = arith.constant 0 : i32
    return %c0_i32, %c0_i32_0 : i32, i32
  }
  func.func @transform_5(%arg0: i32) -> (i32, i32) {
    %c0_i32 = arith.constant 0 : i32
    %c0_i32_0 = arith.constant 0 : i32
    return %arg0, %c0_i32 : i32, i32
  }
}

</mosaic_0001>

<bundles_post_ra>
// kernel: image_extractor_forward.1
= control target key start
LH: loop header
LB: loop body
LE: loop exit
PB: predicated region body
PF: predicated region fallthrough
CT: control target
= control target key end

     0   :  { %10 = vsyncpa [#allocation3], 0  ;;  %s2999_s0 = inlined_call_operand.hbm [shape: f32[2,512], index: 0, kind: input, shape index: {}]   ;;  %s3000_s1 = inlined_call_operand.hbm [shape: f32[512,512], index: 1, kind: input, shape index: {}]   ;;  %s3001_s2 = inlined_call_operand.hbm [shape: f32[1,512], index: 2, kind: input, shape index: {}]   ;;  %s3002_s3 = inlined_call_operand.hbm [shape: f32[512,1024], index: 3, kind: input, shape index: {}]   ;;  %s3003_s4 = inlined_call_operand.hbm [shape: f32[1,1024], index: 4, kind: input, shape index: {}]   ;;  %s3004_s5 = inlined_call_operand.hbm [shape: f32[2,1024], index: 5, kind: output, shape index: {}]  }
   0x1   :  { %11 = vsyncpa [#allocation6], 0 }
   0x2   :  { %12 = vsyncpa [#allocation9], 0 }
   0x3   :  { %13 = vsyncpa [#allocation4], 0  ;;  %s2801_s18 = smov [#allocation5]   ;;  %s2661_s22 = scalar_lea.hbm %s3000_s1, 32768 }
   0x4   :  { %s29_s19 = sshll.u32 %s2801_s18, 4  ;;  %p2662_p0 = scmp.ne.s32.totalorder %s3000_s1, %s2661_s22  ;;  %s30_s19 = int_to_ptr.vmem [resolvable:$true] %s29_s19 }
   0x5   :  { %p2665_p1 = scmp.lt.u32.totalorder %s2661_s22, %s3000_s1 }
   0x7   :  { %p2667_p2 = pnand %p2665_p1, %p2662_p0 }
   0x9   :  { %2670 = shalt.err (!%p2667_p2)
}
   0xa   :  { %s2671_s27 = scalar_lea.vmem %s30_s19, 32768  ;;  %p2676_p4 = scmp.lt.s32.totalorder %s30_s19, %s30_s19 }
   0xb   :  { %p2672_p3 = scmp.ne.s32.totalorder %s30_s19, %s2671_s27  ;;  %p2677_p5 = scmp.lt.s32.totalorder %s2671_s27, %s2671_s27 }
   0xd   :  { %p2678_p6 = por %p2677_p5, %p2676_p4 }
   0xf   :  { %p2679_p7 = pnand %p2678_p6, %p2672_p3 }
  0x11   :  { %2682 = shalt.err (!%p2679_p7)
}
  0x12   :  { %s2802_s28 = smov 512   ;;  %s2803_s29 = smov 32  }
  0x13   :  { %35 = dma.hbm_to_vmem [thread:$0]  %s3000_s1, 32768, %s30_s19, [#allocation6], %s2802_s28, %s2802_s28, %s2803_s29  }
  0x14   :  { %s2804_s7 = smov [#allocation8]   ;;  %s2683_s11 = scalar_lea.hbm %s3002_s3, 65536 }
  0x15   :  { %s51_s8 = sshll.u32 %s2804_s7, 4  ;;  %p2684_p8 = scmp.ne.s32.totalorder %s3002_s3, %s2683_s11  ;;  %s52_s8 = int_to_ptr.vmem [resolvable:$true] %s51_s8 }
  0x16   :  { %p2687_p9 = scmp.lt.u32.totalorder %s2683_s11, %s3002_s3 }
  0x18   :  { %p2689_p10 = pnand %p2687_p9, %p2684_p8 }
  0x1a   :  { %2692 = shalt.err (!%p2689_p10)
}
  0x1b   :  { %s2693_s16 = scalar_lea.vmem %s52_s8, 65536  ;;  %p2698_p12 = scmp.lt.s32.totalorder %s52_s8, %s52_s8 }
  0x1c   :  { %p2694_p11 = scmp.ne.s32.totalorder %s52_s8, %s2693_s16  ;;  %p2699_p13 = scmp.lt.s32.totalorder %s2693_s16, %s2693_s16 }
  0x1e   :  { %p2700_p0 = por %p2699_p13, %p2698_p12 }
  0x20   :  { %p2701_p1 = pnand %p2700_p0, %p2694_p11 }
  0x22   :  { %2704 = shalt.err (!%p2701_p1)
}
  0x23   :  { %s2805_s1 = smov 1024   ;;  %s2806_s17 = smov 64  }
  0x24   :  { %57 = dma.hbm_to_vmem [thread:$0]  %s3002_s3, 65536, %s52_s8, [#allocation9], %s2805_s1, %s2805_s1, %s2806_s17  }
  0x25   :  { %s2807_s20 = smov [#allocation2]   ;;  %s2808_s22 = smov [#allocation7]  }
  0x26   :  { %s20_s21 = sshll.u32 %s2807_s20, 4  ;;  %s42_s23 = sshll.u32 %s2808_s22, 4  ;;  %s21_s21 = int_to_ptr.vmem [resolvable:$true] %s20_s21  ;;  %s43_s23 = int_to_ptr.vmem [resolvable:$true] %s42_s23 }
  0x27   :  { %s2705_s26 = scalar_lea.hbm %s2999_s0, 128 }
  0x28   :  { %p2706_p2 = scmp.ne.s32.totalorder %s2999_s0, %s2705_s26  ;;  %p2709_p3 = scmp.lt.u32.totalorder %s2705_s26, %s2999_s0 }
  0x2a   :  { %p2711_p4 = pnand %p2709_p3, %p2706_p2 }
  0x2c   :  { %2714 = shalt.err (!%p2711_p4)
}
  0x2d   :  { %s2715_s3 = scalar_lea.vmem %s21_s21, 128  ;;  %p2720_p6 = scmp.lt.s32.totalorder %s21_s21, %s21_s21 }
  0x2e   :  { %p2716_p5 = scmp.ne.s32.totalorder %s21_s21, %s2715_s3  ;;  %p2721_p7 = scmp.lt.s32.totalorder %s2715_s3, %s2715_s3 }
  0x30   :  { %p2722_p8 = por %p2721_p7, %p2720_p6 }
  0x32   :  { %p2723_p9 = pnand %p2722_p8, %p2716_p5 }
  0x34   :  { %2726 = shalt.err (!%p2723_p9)
}
  0x35   :  { %23 = dma.hbm_to_vmem [thread:$0]  %s2999_s0, 128, %s21_s21, [#allocation3]  }
  0x36   :  { %s2727_s10 = scalar_lea.hbm %s3001_s2, 64 }
  0x37   :  { %p2728_p10 = scmp.ne.s32.totalorder %s3001_s2, %s2727_s10  ;;  %p2731_p11 = scmp.lt.u32.totalorder %s2727_s10, %s3001_s2 }
  0x39   :  { %p2733_p12 = pnand %p2731_p11, %p2728_p10 }
  0x3b   :  { %2736 = shalt.err (!%p2733_p12)
}
  0x3c   :  { %s2737_s15 = scalar_lea.vmem %s43_s23, 64  ;;  %p2742_p0 = scmp.lt.s32.totalorder %s43_s23, %s43_s23 }
  0x3d   :  { %p2738_p13 = scmp.ne.s32.totalorder %s43_s23, %s2737_s15  ;;  %p2743_p1 = scmp.lt.s32.totalorder %s2737_s15, %s2737_s15 }
  0x3f   :  { %p2744_p2 = por %p2743_p1, %p2742_p0 }
  0x41   :  { %p2745_p3 = pnand %p2744_p2, %p2738_p13 }
  0x43   :  { %2748 = shalt.err (!%p2745_p3)
}
  0x44   :  { %45 = dma.hbm_to_vmem [thread:$0]  %s3001_s2, 64, %s43_s23, [#allocation6]  }
  0x45   :  { %s2809_s1 = smov [#allocation10]   ;;  %s2749_s20 = scalar_lea.hbm %s3003_s4, 128 }
  0x46   :  { %s64_s17 = sshll.u32 %s2809_s1, 4  ;;  %p2750_p4 = scmp.ne.s32.totalorder %s3003_s4, %s2749_s20  ;;  %s65_s17 = int_to_ptr.vmem [resolvable:$true] %s64_s17 }
  0x47   :  { %p2753_p5 = scmp.lt.u32.totalorder %s2749_s20, %s3003_s4 }
  0x49   :  { %p2755_p6 = pnand %p2753_p5, %p2750_p4 }
  0x4b   :  { %2758 = shalt.err (!%p2755_p6)
}
  0x4c   :  { %s2759_s26 = scalar_lea.vmem %s65_s17, 128  ;;  %p2764_p8 = scmp.lt.s32.totalorder %s65_s17, %s65_s17 }
  0x4d   :  { %p2760_p7 = scmp.ne.s32.totalorder %s65_s17, %s2759_s26  ;;  %p2765_p9 = scmp.lt.s32.totalorder %s2759_s26, %s2759_s26 }
  0x4f   :  { %p2766_p10 = por %p2765_p9, %p2764_p8 }
  0x51   :  { %p2767_p11 = pnand %p2766_p10, %p2760_p7 }
  0x53   :  { %2770 = shalt.err (!%p2767_p11)
}
  0x54   :  { %67 = dma.hbm_to_vmem [thread:$0]  %s3003_s4, 128, %s65_s17, [#allocation9]  }
  0x55   :  { %2793 = dma.done.wait [#allocation3], 128  }
  0x56   :  { %2794 = vsyncadd [#allocation3], 4294967168 }
  0x57   :  { %2795 = dma.done.wait [#allocation6], 32832  }
  0x58   :  { %2796 = vsyncadd [#allocation6], 4294934464 }
  0x59   :  { %2797 = dma.done.wait [#allocation9], 65664  }
  0x5a   :  { %2798 = vsyncadd [#allocation9], 4294901632  ;;  %v85_v0 = vld [vmem:[#allocation5 + $0x8] sm:$0xff]  ;;  %v87_v2 = vld [vmem:[#allocation5 + $0x18] sm:$0xff]  ;;  %s2811_s4 = smov [#allocation11]  }
  0x5b   :  { %v89_v1 = vld [vmem:[#allocation5 + $0x28] sm:$0xff]  ;;  %v91_v4 = vld [vmem:[#allocation5 + $0x38] sm:$0xff]  ;;  %v84_v5 = vld [vmem:[#allocation5] sm:$0xff]  ;;  %s1846_s27 = sshll.u32 %s2811_s4, 4  ;;  %s1847_s27 = int_to_ptr.vmem [resolvable:$true] %s1846_s27 }
  0x5c   :  { %v1857_v3 = vpack.c.bf16 %v89_v1, %v85_v0  ;;  %v88_v6 = vld [vmem:[#allocation5 + $0x20] sm:$0xff]  ;;  %v1985_v7 = vpack.c.bf16 %v91_v4, %v87_v2  ;;  %v86_v9 = vld [vmem:[#allocation5 + $0x10] sm:$0xff]  ;;  %v93_v11 = vld [vmem:[#allocation5 + $0x48] sm:$0xff]  ;;  %s2771_s28 = scalar_lea.vmem %s1847_s27, 256  ;;  %p2776_p13 = scmp.lt.s32.totalorder %s1847_s27, %s1847_s27 }
  0x5d   :  { %v1859_v8 = vpack.c.bf16 %v88_v6, %v84_v5  ;;  %v90_v10 = vld [vmem:[#allocation5 + $0x30] sm:$0xff]  ;;  %v97_v13 = vld [vmem:[#allocation5 + $0x68] sm:$0xff]  ;;  %v95_v14 = vld [vmem:[#allocation5 + $0x58] sm:$0xff]  ;;  %p2772_p12 = scmp.ne.s32.totalorder %s1847_s27, %s2771_s28  ;;  %p2777_p0 = scmp.lt.s32.totalorder %s2771_s28, %s2771_s28 }
  0x5e   :  { %1858 = vmatprep.subr.bf16.mxu0 %v1857_v3  ;;  %v1987_v12 = vpack.c.bf16 %v90_v10, %v86_v9  ;;  %v99_v15 = vld [vmem:[#allocation5 + $0x78] sm:$0xff]  ;;  %1986 = vmatprep.subr.bf16.mxu1 %v1985_v7  ;;  %v1861_v16 = vpack.c.bf16 %v97_v13, %v93_v11  ;;  %v92_v18 = vld [vmem:[#allocation5 + $0x40] sm:$0xff]  ;;  %v94_v20 = vld [vmem:[#allocation5 + $0x50] sm:$0xff] }
  0x5f   :  { %1860 = vmatpush1.bf16.msra.mxu0 %v1859_v8  ;;  %v1989_v17 = vpack.c.bf16 %v99_v15, %v95_v14  ;;  %v96_v19 = vld [vmem:[#allocation5 + $0x60] sm:$0xff]  ;;  %v98_v22 = vld [vmem:[#allocation5 + $0x70] sm:$0xff]  ;;  %v101_v23 = vld [vmem:[#allocation5 + $0x88] sm:$0xff]  ;;  %p2778_p1 = por %p2777_p0, %p2776_p13 }
  0x60   :  { %1988 = vmatpush1.bf16.msra.mxu1 %v1987_v12  ;;  %v1863_v21 = vpack.c.bf16 %v96_v19, %v92_v18  ;;  %v105_v24 = vld [vmem:[#allocation5 + $0xa8] sm:$0xff]  ;;  %1862 = vmatprep.subr.bf16.mxu0 %v1861_v16  ;;  %v1991_v25 = vpack.c.bf16 %v98_v22, %v94_v20  ;;  %v103_v27 = vld [vmem:[#allocation5 + $0x98] sm:$0xff]  ;;  %v100_v29 = vld [vmem:[#allocation5 + $0x80] sm:$0xff] }
  0x61   :  { %1990 = vmatprep.subr.bf16.mxu1 %v1989_v17  ;;  %v1865_v26 = vpack.c.bf16 %v105_v24, %v101_v23  ;;  %v107_v28 = vld [vmem:[#allocation5 + $0xb8] sm:$0xff]  ;;  %v104_v31 = vld [vmem:[#allocation5 + $0xa0] sm:$0xff]  ;;  %v102_v32 = vld [vmem:[#allocation5 + $0x90] sm:$0xff]  ;;  %p2779_p2 = pnand %p2778_p1, %p2772_p12 }
  0x62   :  { %v1993_v30 = vpack.c.bf16 %v107_v28, %v103_v27  ;;  %v106_v33 = vld [vmem:[#allocation5 + $0xb0] sm:$0xff]  ;;  %v1867_v34 = vpack.c.bf16 %v104_v31, %v100_v29  ;;  %v109_v35 = vld [vmem:[#allocation5 + $0xc8] sm:$0xff]  ;;  %v111_v37 = vld [vmem:[#allocation5 + $0xd8] sm:$0xff] }
  0x63   :  { %1864 = vmatpush1.bf16.msra.mxu0 %v1863_v21  ;;  %v113_v36 = vld [vmem:[#allocation5 + $0xe8] sm:$0xff]  ;;  %v1995_v38 = vpack.c.bf16 %v106_v33, %v102_v32  ;;  %v115_v40 = vld [vmem:[#allocation5 + $0xf8] sm:$0xff]  ;;  %v108_v41 = vld [vmem:[#allocation5 + $0xc0] sm:$0xff] }
  0x64   :  { %1992 = vmatpush1.bf16.msra.mxu1 %v1991_v25  ;;  %1866 = vmatprep.subr.bf16.mxu0 %v1865_v26  ;;  %v1869_v39 = vpack.c.bf16 %v113_v36, %v109_v35  ;;  %v112_v42 = vld [vmem:[#allocation5 + $0xe0] sm:$0xff]  ;;  %v1997_v43 = vpack.c.bf16 %v115_v40, %v111_v37  ;;  %v110_v44 = vld [vmem:[#allocation5 + $0xd0] sm:$0xff]  ;;  %v117_v46 = vld [vmem:[#allocation5 + $0x108] sm:$0xff] }
  0x65   :  { %1994 = vmatprep.subr.bf16.mxu1 %v1993_v30  ;;  %v114_v45 = vld [vmem:[#allocation5 + $0xf0] sm:$0xff]  ;;  %v121_v47 = vld [vmem:[#allocation5 + $0x128] sm:$0xff]  ;;  %v119_v48 = vld [vmem:[#allocation5 + $0x118] sm:$0xff]  ;;  %v1871_v50 = vpack.c.bf16 %v112_v42, %v108_v41 }
  0x66   :  { %v123_v49 = vld [vmem:[#allocation5 + $0x138] sm:$0xff]  ;;  %v1999_v51 = vpack.c.bf16 %v114_v45, %v110_v44  ;;  %v1873_v52 = vpack.c.bf16 %v121_v47, %v117_v46  ;;  %v116_v53 = vld [vmem:[#allocation5 + $0x100] sm:$0xff]  ;;  %v118_v55 = vld [vmem:[#allocation5 + $0x110] sm:$0xff]  ;;  %v342_v46 = vlaneseq  ;;  %v2810_v47 = vmov 1983009808  }
  0x67   :  { %1868 = vmatpush1.bf16.msra.mxu0 %v1867_v34  ;;  %v120_v54 = vld [vmem:[#allocation5 + $0x120] sm:$0xff]  ;;  %v2001_v56 = vpack.c.bf16 %v123_v49, %v119_v48  ;;  %v122_v57 = vld [vmem:[#allocation5 + $0x130] sm:$0xff]  ;;  %v125_v58 = vld [vmem:[#allocation5 + $0x148] sm:$0xff]  ;;  %v365_v48 = vunpack.c.l.s4 %v2810_v47 }
  0x68   :  { %1996 = vmatpush1.bf16.msra.mxu1 %v1995_v38  ;;  %1870 = vmatprep.subr.bf16.mxu0 %v1869_v39  ;;  %v129_v59 = vld [vmem:[#allocation5 + $0x168] sm:$0xff]  ;;  %v127_v60 = vld [vmem:[#allocation5 + $0x158] sm:$0xff]  ;;  %v1875_v62 = vpack.c.bf16 %v120_v54, %v116_v53  ;;  %v2003_v63 = vpack.c.bf16 %v122_v57, %v118_v55  ;;  %v124_v1 = vld [vmem:[#allocation5 + $0x140] sm:$0xff] }
  0x69   :  { %1998 = vmatprep.subr.bf16.mxu1 %v1997_v43  ;;  %v131_v61 = vld [vmem:[#allocation5 + $0x178] sm:$0xff]  ;;  %v1877_v0 = vpack.c.bf16 %v129_v59, %v125_v58  ;;  %v128_v2 = vld [vmem:[#allocation5 + $0x160] sm:$0xff]  ;;  %v126_v3 = vld [vmem:[#allocation5 + $0x150] sm:$0xff] }
  0x6a   :  { %v2005_v4 = vpack.c.bf16 %v131_v61, %v127_v60  ;;  %v130_v5 = vld [vmem:[#allocation5 + $0x170] sm:$0xff]  ;;  %v133_v6 = vld [vmem:[#allocation5 + $0x188] sm:$0xff]  ;;  %v135_v8 = vld [vmem:[#allocation5 + $0x198] sm:$0xff]  ;;  %v1879_v10 = vpack.c.bf16 %v128_v2, %v124_v1  ;;  %v2902_v61 = vshrl.u32 %v342_v46, 7 }
  0x6b   :  { %1872 = vmatpush1.bf16.msra.mxu0 %v1871_v50  ;;  %v137_v7 = vld [vmem:[#allocation5 + $0x1a8] sm:$0xff]  ;;  %v139_v9 = vld [vmem:[#allocation5 + $0x1b8] sm:$0xff]  ;;  %v2007_v11 = vpack.c.bf16 %v130_v5, %v126_v3  ;;  %v132_v13 = vld [vmem:[#allocation5 + $0x180] sm:$0xff] }
  0x6c   :  { %2000 = vmatpush1.bf16.msra.mxu1 %v1999_v51  ;;  %1874 = vmatprep.subr.bf16.mxu0 %v1873_v52  ;;  %v1881_v12 = vpack.c.bf16 %v137_v7, %v133_v6  ;;  %v136_v14 = vld [vmem:[#allocation5 + $0x1a0] sm:$0xff]  ;;  %v134_v15 = vld [vmem:[#allocation5 + $0x190] sm:$0xff]  ;;  %v2009_v16 = vpack.c.bf16 %v139_v9, %v135_v8  ;;  %v141_v18 = vld [vmem:[#allocation5 + $0x1c8] sm:$0xff] }
  0x6d   :  { %2002 = vmatprep.subr.bf16.mxu1 %v2001_v56  ;;  %v138_v17 = vld [vmem:[#allocation5 + $0x1b0] sm:$0xff]  ;;  %v145_v19 = vld [vmem:[#allocation5 + $0x1e8] sm:$0xff]  ;;  %v143_v20 = vld [vmem:[#allocation5 + $0x1d8] sm:$0xff]  ;;  %v1883_v22 = vpack.c.bf16 %v136_v14, %v132_v13 }
  0x6e   :  { %v147_v21 = vld [vmem:[#allocation5 + $0x1f8] sm:$0xff]  ;;  %v2011_v23 = vpack.c.bf16 %v138_v17, %v134_v15  ;;  %v1885_v24 = vpack.c.bf16 %v145_v19, %v141_v18  ;;  %v140_v25 = vld [vmem:[#allocation5 + $0x1c0] sm:$0xff]  ;;  %v142_v27 = vld [vmem:[#allocation5 + $0x1d0] sm:$0xff] }
  0x6f   :  { %1876 = vmatpush1.bf16.msra.mxu0 %v1875_v62  ;;  %v144_v26 = vld [vmem:[#allocation5 + $0x1e0] sm:$0xff]  ;;  %v2013_v28 = vpack.c.bf16 %v147_v21, %v143_v20  ;;  %v146_v29 = vld [vmem:[#allocation5 + $0x1f0] sm:$0xff]  ;;  %v149_v30 = vld [vmem:[#allocation5 + $0x208] sm:$0xff]  ;;  %v366_v62 = vunpack.c.0.s8 %v365_v48 }
  0x70   :  { %2004 = vmatpush1.bf16.msra.mxu1 %v2003_v63  ;;  %1878 = vmatprep.subr.bf16.mxu0 %v1877_v0  ;;  %v153_v31 = vld [vmem:[#allocation5 + $0x228] sm:$0xff]  ;;  %v151_v32 = vld [vmem:[#allocation5 + $0x218] sm:$0xff]  ;;  %v1887_v34 = vpack.c.bf16 %v144_v26, %v140_v25  ;;  %v2015_v35 = vpack.c.bf16 %v146_v29, %v142_v27  ;;  %v148_v37 = vld [vmem:[#allocation5 + $0x200] sm:$0xff] }
  0x71   :  { %2006 = vmatprep.subr.bf16.mxu1 %v2005_v4  ;;  %v155_v33 = vld [vmem:[#allocation5 + $0x238] sm:$0xff]  ;;  %v1889_v36 = vpack.c.bf16 %v153_v31, %v149_v30  ;;  %v152_v38 = vld [vmem:[#allocation5 + $0x220] sm:$0xff]  ;;  %v150_v39 = vld [vmem:[#allocation5 + $0x210] sm:$0xff] }
  0x72   :  { %v2017_v40 = vpack.c.bf16 %v155_v33, %v151_v32  ;;  %v154_v41 = vld [vmem:[#allocation5 + $0x230] sm:$0xff]  ;;  %v157_v42 = vld [vmem:[#allocation5 + $0x248] sm:$0xff]  ;;  %v159_v44 = vld [vmem:[#allocation5 + $0x258] sm:$0xff]  ;;  %v1891_v49 = vpack.c.bf16 %v152_v38, %v148_v37 }
  0x73   :  { %1880 = vmatpush1.bf16.msra.mxu0 %v1879_v10  ;;  %v161_v43 = vld [vmem:[#allocation5 + $0x268] sm:$0xff]  ;;  %v163_v45 = vld [vmem:[#allocation5 + $0x278] sm:$0xff]  ;;  %v2019_v50 = vpack.c.bf16 %v154_v41, %v150_v39  ;;  %v156_v52 = vld [vmem:[#allocation5 + $0x240] sm:$0xff] }
  0x74   :  { %2008 = vmatpush1.bf16.msra.mxu1 %v2007_v11  ;;  %1882 = vmatprep.subr.bf16.mxu0 %v1881_v12  ;;  %v1893_v51 = vpack.c.bf16 %v161_v43, %v157_v42  ;;  %v160_v53 = vld [vmem:[#allocation5 + $0x260] sm:$0xff]  ;;  %v158_v54 = vld [vmem:[#allocation5 + $0x250] sm:$0xff]  ;;  %v2021_v55 = vpack.c.bf16 %v163_v45, %v159_v44  ;;  %v165_v57 = vld [vmem:[#allocation5 + $0x288] sm:$0xff]  ;;  %v2905_v11 = vsub.s32 %v366_v62, %v2902_v61 }
  0x75   :  { %2010 = vmatprep.subr.bf16.mxu1 %v2009_v16  ;;  %v162_v56 = vld [vmem:[#allocation5 + $0x270] sm:$0xff]  ;;  %v169_v58 = vld [vmem:[#allocation5 + $0x2a8] sm:$0xff]  ;;  %v167_v59 = vld [vmem:[#allocation5 + $0x298] sm:$0xff]  ;;  %v1895_v63 = vpack.c.bf16 %v160_v53, %v156_v52 }
  0x76   :  { %v171_v60 = vld [vmem:[#allocation5 + $0x2b8] sm:$0xff]  ;;  %v2023_v0 = vpack.c.bf16 %v162_v56, %v158_v54  ;;  %v1897_v1 = vpack.c.bf16 %v169_v58, %v165_v57  ;;  %v164_v2 = vld [vmem:[#allocation5 + $0x280] sm:$0xff]  ;;  %v166_v4 = vld [vmem:[#allocation5 + $0x290] sm:$0xff] }
  0x77   :  { %1884 = vmatpush1.bf16.msra.mxu0 %v1883_v22  ;;  %v168_v3 = vld [vmem:[#allocation5 + $0x2a0] sm:$0xff]  ;;  %v2025_v5 = vpack.c.bf16 %v171_v60, %v167_v59  ;;  %v170_v6 = vld [vmem:[#allocation5 + $0x2b0] sm:$0xff]  ;;  %v173_v7 = vld [vmem:[#allocation5 + $0x2c8] sm:$0xff] }
  0x78   :  { %2012 = vmatpush1.bf16.msra.mxu1 %v2011_v23  ;;  %1886 = vmatprep.subr.bf16.mxu0 %v1885_v24  ;;  %v177_v8 = vld [vmem:[#allocation5 + $0x2e8] sm:$0xff]  ;;  %v175_v9 = vld [vmem:[#allocation5 + $0x2d8] sm:$0xff]  ;;  %v1899_v12 = vpack.c.bf16 %v168_v3, %v164_v2  ;;  %v172_v13 = vld [vmem:[#allocation5 + $0x2c0] sm:$0xff]  ;;  %v2027_v14 = vpack.c.bf16 %v170_v6, %v166_v4 }
  0x79   :  { %2014 = vmatprep.subr.bf16.mxu1 %v2013_v28  ;;  %v179_v10 = vld [vmem:[#allocation5 + $0x2f8] sm:$0xff]  ;;  %v1901_v15 = vpack.c.bf16 %v177_v8, %v173_v7  ;;  %v176_v16 = vld [vmem:[#allocation5 + $0x2e0] sm:$0xff]  ;;  %v174_v17 = vld [vmem:[#allocation5 + $0x2d0] sm:$0xff] }
  0x7a   :  { %v178_v18 = vld [vmem:[#allocation5 + $0x2f0] sm:$0xff]  ;;  %v2029_v19 = vpack.c.bf16 %v179_v10, %v175_v9  ;;  %v181_v20 = vld [vmem:[#allocation5 + $0x308] sm:$0xff]  ;;  %v2907_v22 = vld [vmem:[#allocation2] sm:$0xff]  ;;  %v1903_v26 = vpack.c.bf16 %v176_v16, %v172_v13 }
  0x7b   :  { %1888 = vmatpush1.bf16.msra.mxu0 %v1887_v34  ;;  %v185_v21 = vld [vmem:[#allocation5 + $0x328] sm:$0xff]  ;;  %v183_v23 = vld [vmem:[#allocation5 + $0x318] sm:$0xff]  ;;  %v2911_v25 = vrot.slane %v2907_v22, %v2905_v11  ;;  %v2031_v27 = vpack.c.bf16 %v178_v18, %v174_v17  ;;  %v180_v29 = vld [vmem:[#allocation5 + $0x300] sm:$0xff]  ;;  %v363_v8 = vcombine.high %v2907_v22, %v2907_v22 }
  0x7c   :  { %2016 = vmatpush1.bf16.msra.mxu1 %v2015_v35  ;;  %1890 = vmatprep.subr.bf16.mxu0 %v1889_v36  ;;  %v187_v24 = vld [vmem:[#allocation5 + $0x338] sm:$0xff]  ;;  %v1905_v28 = vpack.c.bf16 %v185_v21, %v181_v20  ;;  %v184_v30 = vld [vmem:[#allocation5 + $0x320] sm:$0xff]  ;;  %v182_v31 = vld [vmem:[#allocation5 + $0x310] sm:$0xff] }
  0x7d   :  { %2018 = vmatprep.subr.bf16.mxu1 %v2017_v40  ;;  %v378_v32 = vcombine.high %v2911_v25, %v2911_v25  ;;  %v2033_v33 = vpack.c.bf16 %v187_v24, %v183_v23  ;;  %v186_v34 = vld [vmem:[#allocation5 + $0x330] sm:$0xff]  ;;  %v189_v35 = vld [vmem:[#allocation5 + $0x348] sm:$0xff]  ;;  %v191_v37 = vld [vmem:[#allocation5 + $0x358] sm:$0xff]  ;;  %v1907_v39 = vpack.c.bf16 %v184_v30, %v180_v29  ;;  %v2918_v22 = vrot.slane %v363_v8, %v2905_v11 }
  0x7e   :  { %v193_v36 = vld [vmem:[#allocation5 + $0x368] sm:$0xff]  ;;  %v195_v38 = vld [vmem:[#allocation5 + $0x378] sm:$0xff]  ;;  %v2035_v40 = vpack.c.bf16 %v186_v34, %v182_v31  ;;  %v188_v42 = vld [vmem:[#allocation5 + $0x340] sm:$0xff] }
  0x7f   :  { %1892 = vmatpush1.bf16.msra.mxu0 %v1891_v49  ;;  %448 = vmatprep.mubr.f32.mxu0 %v378_v32  ;;  %v1909_v41 = vpack.c.bf16 %v193_v36, %v189_v35  ;;  %v192_v43 = vld [vmem:[#allocation5 + $0x360] sm:$0xff]  ;;  %v190_v44 = vld [vmem:[#allocation5 + $0x350] sm:$0xff]  ;;  %v2037_v45 = vpack.c.bf16 %v195_v38, %v191_v37  ;;  %v197_v47 = vld [vmem:[#allocation5 + $0x388] sm:$0xff]  ;;  %v379_v38 = vcombine.high %v2918_v22, %v2918_v22 }
  0x80   :  { %2020 = vmatpush1.bf16.msra.mxu1 %v2019_v50  ;;  %1894 = vmatprep.subr.bf16.mxu0 %v1893_v51  ;;  %v194_v46 = vld [vmem:[#allocation5 + $0x370] sm:$0xff]  ;;  %v201_v48 = vld [vmem:[#allocation5 + $0x3a8] sm:$0xff]  ;;  %v199_v49 = vld [vmem:[#allocation5 + $0x398] sm:$0xff]  ;;  %v1911_v51 = vpack.c.bf16 %v192_v43, %v188_v42 }
  0x81   :  { %2022 = vmatprep.subr.bf16.mxu1 %v2021_v55  ;;  %590 = vmatprep.mubr.f32.mxu1 %v378_v32  ;;  %v203_v50 = vld [vmem:[#allocation5 + $0x3b8] sm:$0xff]  ;;  %v2039_v52 = vpack.c.bf16 %v194_v46, %v190_v44  ;;  %v1913_v53 = vpack.c.bf16 %v201_v48, %v197_v47  ;;  %v196_v54 = vld [vmem:[#allocation5 + $0x380] sm:$0xff]  ;;  %v198_v56 = vld [vmem:[#allocation5 + $0x390] sm:$0xff] }
  0x82   :  { %v200_v55 = vld [vmem:[#allocation5 + $0x3a0] sm:$0xff]  ;;  %v2041_v57 = vpack.c.bf16 %v203_v50, %v199_v49  ;;  %v202_v58 = vld [vmem:[#allocation5 + $0x3b0] sm:$0xff]  ;;  %v205_v59 = vld [vmem:[#allocation5 + $0x3c8] sm:$0xff] }
  0x83   :  { %1896 = vmatpush1.bf16.msra.mxu0 %v1895_v63  ;;  %v209_v60 = vld [vmem:[#allocation5 + $0x3e8] sm:$0xff]  ;;  %v207_v62 = vld [vmem:[#allocation5 + $0x3d8] sm:$0xff]  ;;  %v204_v3 = vld [vmem:[#allocation5 + $0x3c0] sm:$0xff] }
  0x84   :  { %2024 = vmatpush1.bf16.msra.mxu1 %v2023_v0  ;;  %1898 = vmatprep.subr.bf16.mxu0 %v1897_v1  ;;  %v211_v63 = vld [vmem:[#allocation5 + $0x3f8] sm:$0xff]  ;;  %v1915_v0 = vpack.c.bf16 %v200_v55, %v196_v54  ;;  %v2043_v1 = vpack.c.bf16 %v202_v58, %v198_v56  ;;  %v1917_v2 = vpack.c.bf16 %v209_v60, %v205_v59  ;;  %v208_v4 = vld [vmem:[#allocation5 + $0x3e0] sm:$0xff]  ;;  %v210_v7 = vld [vmem:[#allocation5 + $0x3f0] sm:$0xff] }
  0x85   :  { %2026 = vmatprep.subr.bf16.mxu1 %v2025_v5  ;;  %v206_v5 = vld [vmem:[#allocation5 + $0x3d0] sm:$0xff]  ;;  %v2045_v6 = vpack.c.bf16 %v211_v63, %v207_v62  ;;  %v213_v9 = vld [vmem:[#allocation5 + $0x408] sm:$0xff]  ;;  %v219_v13 = vld [vmem:[#allocation5 + $0x438] sm:$0xff] }
  0x86   :  { %v217_v10 = vld [vmem:[#allocation5 + $0x428] sm:$0xff]  ;;  %v212_v17 = vld [vmem:[#allocation5 + $0x400] sm:$0xff]  ;;  %v218_v21 = vld [vmem:[#allocation5 + $0x430] sm:$0xff] }
  0x87   :  { %1900 = vmatpush1.bf16.msra.mxu0 %v1899_v12  ;;  %v215_v12 = vld [vmem:[#allocation5 + $0x418] sm:$0xff]  ;;  %v1921_v16 = vpack.c.bf16 %v217_v10, %v213_v9  ;;  %v216_v18 = vld [vmem:[#allocation5 + $0x420] sm:$0xff]  ;;  %v221_v23 = vld [vmem:[#allocation5 + $0x448] sm:$0xff] }
  0x88   :  { %2028 = vmatpush1.bf16.msra.mxu1 %v2027_v14  ;;  %1902 = vmatprep.subr.bf16.mxu0 %v1901_v15  ;;  %v1919_v14 = vpack.c.bf16 %v208_v4, %v204_v3  ;;  %v2047_v15 = vpack.c.bf16 %v210_v7, %v206_v5  ;;  %v2049_v20 = vpack.c.bf16 %v219_v13, %v215_v12  ;;  %v225_v24 = vld [vmem:[#allocation5 + $0x468] sm:$0xff]  ;;  %v220_v31 = vld [vmem:[#allocation5 + $0x440] sm:$0xff]  ;;  %v226_v35 = vld [vmem:[#allocation5 + $0x470] sm:$0xff] }
  0x89   :  { %2030 = vmatprep.subr.bf16.mxu1 %v2029_v19  ;;  %v214_v19 = vld [vmem:[#allocation5 + $0x410] sm:$0xff]  ;;  %v1925_v30 = vpack.c.bf16 %v225_v24, %v221_v23  ;;  %v224_v32 = vld [vmem:[#allocation5 + $0x460] sm:$0xff]  ;;  %v229_v36 = vld [vmem:[#allocation5 + $0x488] sm:$0xff] }
  0x8a   :  { %v2051_v29 = vpack.c.bf16 %v218_v21, %v214_v19  ;;  %v233_v37 = vld [vmem:[#allocation5 + $0x4a8] sm:$0xff]  ;;  %v228_v44 = vld [vmem:[#allocation5 + $0x480] sm:$0xff]  ;;  %v230_v46 = vld [vmem:[#allocation5 + $0x490] sm:$0xff] }
  0x8b   :  { %1904 = vmatpush1.bf16.msra.mxu0 %v1903_v26  ;;  %v223_v26 = vld [vmem:[#allocation5 + $0x458] sm:$0xff]  ;;  %v1929_v43 = vpack.c.bf16 %v233_v37, %v229_v36  ;;  %v234_v48 = vld [vmem:[#allocation5 + $0x4b0] sm:$0xff]  ;;  %v237_v49 = vld [vmem:[#allocation5 + $0x4c8] sm:$0xff] }
  0x8c   :  { %2032 = vmatpush1.bf16.msra.mxu1 %v2031_v27  ;;  %1906 = vmatprep.subr.bf16.mxu0 %v1905_v28  ;;  %v227_v27 = vld [vmem:[#allocation5 + $0x478] sm:$0xff]  ;;  %v1923_v28 = vpack.c.bf16 %v216_v18, %v212_v17  ;;  %v241_v50 = vld [vmem:[#allocation5 + $0x4e8] sm:$0xff]  ;;  %v236_v55 = vld [vmem:[#allocation5 + $0x4c0] sm:$0xff] }
  0x8d   :  { %2034 = vmatprep.subr.bf16.mxu1 %v2033_v33  ;;  %v222_v33 = vld [vmem:[#allocation5 + $0x450] sm:$0xff]  ;;  %v2053_v34 = vpack.c.bf16 %v227_v27, %v223_v26  ;;  %v1933_v54 = vpack.c.bf16 %v241_v50, %v237_v49  ;;  %v240_v56 = vld [vmem:[#allocation5 + $0x4e0] sm:$0xff]  ;;  %v245_v60 = vld [vmem:[#allocation5 + $0x508] sm:$0xff] }
  0x8e   :  { %v2055_v42 = vpack.c.bf16 %v226_v35, %v222_v33  ;;  %v242_v59 = vld [vmem:[#allocation5 + $0x4f0] sm:$0xff]  ;;  %v249_v62 = vld [vmem:[#allocation5 + $0x528] sm:$0xff]  ;;  %v247_v63 = vld [vmem:[#allocation5 + $0x518] sm:$0xff] }
  0x8f   :  { %1908 = vmatpush1.bf16.msra.mxu0 %v1907_v39  ;;  %v231_v39 = vld [vmem:[#allocation5 + $0x498] sm:$0xff]  ;;  %v1937_v3 = vpack.c.bf16 %v249_v62, %v245_v60  ;;  %v244_v4 = vld [vmem:[#allocation5 + $0x500] sm:$0xff]  ;;  %v250_v8 = vld [vmem:[#allocation5 + $0x530] sm:$0xff] }
  0x90   :  { %2036 = vmatpush1.bf16.msra.mxu1 %v2035_v40  ;;  %1910 = vmatprep.subr.bf16.mxu0 %v1909_v41  ;;  %v235_v40 = vld [vmem:[#allocation5 + $0x4b8] sm:$0xff]  ;;  %v1927_v41 = vpack.c.bf16 %v224_v32, %v220_v31  ;;  %v248_v5 = vld [vmem:[#allocation5 + $0x520] sm:$0xff]  ;;  %v253_v9 = vld [vmem:[#allocation5 + $0x548] sm:$0xff] }
  0x91   :  { %2038 = vmatprep.subr.bf16.mxu1 %v2037_v45  ;;  %v232_v45 = vld [vmem:[#allocation5 + $0x4a0] sm:$0xff]  ;;  %v2057_v47 = vpack.c.bf16 %v235_v40, %v231_v39  ;;  %v257_v10 = vld [vmem:[#allocation5 + $0x568] sm:$0xff]  ;;  %v255_v12 = vld [vmem:[#allocation5 + $0x558] sm:$0xff] }
  0x92   :  { %v259_v13 = vld [vmem:[#allocation5 + $0x578] sm:$0xff]  ;;  %v252_v17 = vld [vmem:[#allocation5 + $0x540] sm:$0xff]  ;;  %v254_v19 = vld [vmem:[#allocation5 + $0x550] sm:$0xff] }
  0x93   :  { %1912 = vmatpush1.bf16.msra.mxu0 %v1911_v51  ;;  %v239_v51 = vld [vmem:[#allocation5 + $0x4d8] sm:$0xff]  ;;  %v256_v18 = vld [vmem:[#allocation5 + $0x560] sm:$0xff]  ;;  %v258_v21 = vld [vmem:[#allocation5 + $0x570] sm:$0xff] }
  0x94   :  { %2040 = vmatpush1.bf16.msra.mxu1 %v2039_v52  ;;  %1914 = vmatprep.subr.bf16.mxu0 %v1913_v53  ;;  %v243_v52 = vld [vmem:[#allocation5 + $0x4f8] sm:$0xff]  ;;  %v1931_v53 = vpack.c.bf16 %v232_v45, %v228_v44  ;;  %v261_v23 = vld [vmem:[#allocation5 + $0x588] sm:$0xff]  ;;  %v260_v31 = vld [vmem:[#allocation5 + $0x580] sm:$0xff] }
  0x95   :  { %2042 = vmatprep.subr.bf16.mxu1 %v2041_v57  ;;  %v238_v57 = vld [vmem:[#allocation5 + $0x4d0] sm:$0xff]  ;;  %v2061_v58 = vpack.c.bf16 %v243_v52, %v239_v51  ;;  %v265_v24 = vld [vmem:[#allocation5 + $0x5a8] sm:$0xff]  ;;  %v263_v26 = vld [vmem:[#allocation5 + $0x598] sm:$0xff] }
  0x96   :  { %v267_v27 = vld [vmem:[#allocation5 + $0x5b8] sm:$0xff]  ;;  %v264_v32 = vld [vmem:[#allocation5 + $0x5a0] sm:$0xff]  ;;  %v262_v33 = vld [vmem:[#allocation5 + $0x590] sm:$0xff] }
  0x97   :  { %1916 = vmatpush1.bf16.msra.mxu0 %v1915_v0  ;;  %v251_v0 = vld [vmem:[#allocation5 + $0x538] sm:$0xff]  ;;  %v266_v35 = vld [vmem:[#allocation5 + $0x5b0] sm:$0xff]  ;;  %v269_v36 = vld [vmem:[#allocation5 + $0x5c8] sm:$0xff]  ;;  %v1947_v40 = vpack.c.bf16 %v264_v32, %v260_v31 }
  0x98   :  { %2044 = vmatpush1.bf16.msra.mxu1 %v2043_v1  ;;  %1918 = vmatprep.subr.bf16.mxu0 %v1917_v2  ;;  %v1935_v1 = vpack.c.bf16 %v240_v56, %v236_v55  ;;  %v2063_v2 = vpack.c.bf16 %v242_v59, %v238_v57  ;;  %v2065_v7 = vpack.c.bf16 %v251_v0, %v247_v63  ;;  %v273_v37 = vld [vmem:[#allocation5 + $0x5e8] sm:$0xff]  ;;  %v275_v39 = vld [vmem:[#allocation5 + $0x5f8] sm:$0xff]  ;;  %v272_v44 = vld [vmem:[#allocation5 + $0x5e0] sm:$0xff] }
  0x99   :  { %2046 = vmatprep.subr.bf16.mxu1 %v2045_v6  ;;  %v246_v6 = vld [vmem:[#allocation5 + $0x510] sm:$0xff]  ;;  %v281_v49 = vld [vmem:[#allocation5 + $0x628] sm:$0xff]  ;;  %v279_v50 = vld [vmem:[#allocation5 + $0x618] sm:$0xff] }
  0x9a   :  { %v270_v45 = vld [vmem:[#allocation5 + $0x5d0] sm:$0xff]  ;;  %v283_v51 = vld [vmem:[#allocation5 + $0x638] sm:$0xff]  ;;  %v280_v55 = vld [vmem:[#allocation5 + $0x620] sm:$0xff] }
  0x9b   :  { %1920 = vmatpush1.bf16.msra.mxu0 %v1919_v14  ;;  %v1939_v14 = vpack.c.bf16 %v248_v5, %v244_v4  ;;  %v278_v56 = vld [vmem:[#allocation5 + $0x610] sm:$0xff]  ;;  %v2081_v57 = vpack.c.bf16 %v283_v51, %v279_v50  ;;  %v285_v59 = vld [vmem:[#allocation5 + $0x648] sm:$0xff]  ;;  %v287_v62 = vld [vmem:[#allocation5 + $0x658] sm:$0xff] }
  0x9c   :  { %2048 = vmatpush1.bf16.msra.mxu1 %v2047_v15  ;;  %1922 = vmatprep.subr.bf16.mxu0 %v1921_v16  ;;  %v2067_v15 = vpack.c.bf16 %v250_v8, %v246_v6  ;;  %v1941_v16 = vpack.c.bf16 %v257_v10, %v253_v9  ;;  %v289_v60 = vld [vmem:[#allocation5 + $0x668] sm:$0xff]  ;;  %v291_v63 = vld [vmem:[#allocation5 + $0x678] sm:$0xff]  ;;  %v288_v4 = vld [vmem:[#allocation5 + $0x660] sm:$0xff] }
  0x9d   :  { %2050 = vmatprep.subr.bf16.mxu1 %v2049_v20  ;;  %v2069_v20 = vpack.c.bf16 %v259_v13, %v255_v12  ;;  %v286_v5 = vld [vmem:[#allocation5 + $0x650] sm:$0xff]  ;;  %v2085_v6 = vpack.c.bf16 %v291_v63, %v287_v62  ;;  %v293_v8 = vld [vmem:[#allocation5 + $0x688] sm:$0xff]  ;;  %v295_v10 = vld [vmem:[#allocation5 + $0x698] sm:$0xff] }
  0x9e   :  { %449 = vmatmul.mubr.f32.vlgmr.msra.gmra.mrb[0].mxu0 %v2911_v25  ;;  %v297_v9 = vld [vmem:[#allocation5 + $0x6a8] sm:$0xff]  ;;  %v299_v12 = vld [vmem:[#allocation5 + $0x6b8] sm:$0xff]  ;;  %v304_v31 = vld [vmem:[#allocation5 + $0x6e0] sm:$0xff] }
  0x9f   :  { %1924 = vmatpush1.bf16.msra.mxu0 %v1923_v28  ;;  %591 = vmatmul.mubr.f32.vlgmr.msra.gmra.mrb[0].mxu1 %v2911_v25  ;;  %v2059_v25 = vpack.c.bf16 %v234_v48, %v230_v46  ;;  %v1943_v28 = vpack.c.bf16 %v256_v18, %v252_v17  ;;  %v277_v48 = vld [vmem:[#allocation5 + $0x608] sm:$0xff]  ;;  %v296_v17 = vld [vmem:[#allocation5 + $0x6a0] sm:$0xff]  ;;  %v294_v18 = vld [vmem:[#allocation5 + $0x690] sm:$0xff] }
  0xa0   :  { %2052 = vmatpush1.bf16.msra.mxu1 %v2051_v29  ;;  %1926 = vmatprep.subr.bf16.mxu0 %v1925_v30  ;;  %v2071_v29 = vpack.c.bf16 %v258_v21, %v254_v19  ;;  %v1945_v30 = vpack.c.bf16 %v265_v24, %v261_v23  ;;  %v2089_v19 = vpack.c.bf16 %v299_v12, %v295_v10  ;;  %v301_v21 = vld [vmem:[#allocation5 + $0x6c8] sm:$0xff]  ;;  %v303_v24 = vld [vmem:[#allocation5 + $0x6d8] sm:$0xff]  ;;  %v302_v32 = vld [vmem:[#allocation5 + $0x6d0] sm:$0xff] }
  0xa1   :  { %2054 = vmatprep.subr.bf16.mxu1 %v2053_v34  ;;  %519 = vmatprep.mubr.f32.mxu0 %v379_v38  ;;  %v2073_v34 = vpack.c.bf16 %v267_v27, %v263_v26  ;;  %v305_v23 = vld [vmem:[#allocation5 + $0x6e8] sm:$0xff]  ;;  %v307_v26 = vld [vmem:[#allocation5 + $0x6f8] sm:$0xff] }
  0xa2   :  { %661 = vmatprep.mubr.f32.mxu1 %v379_v38  ;;  %v271_v38 = vld [vmem:[#allocation5 + $0x5d8] sm:$0xff] }
  0xa3   :  { %1928 = vmatpush1.bf16.msra.mxu0 %v1927_v41  ;;  %v2075_v41 = vpack.c.bf16 %v266_v35, %v262_v33  ;;  %v2077_v46 = vpack.c.bf16 %v275_v39, %v271_v38  ;;  %v2093_v33 = vpack.c.bf16 %v307_v26, %v303_v24  ;;  %v309_v35 = vld [vmem:[#allocation5 + $0x708] sm:$0xff]  ;;  %v315_v38 = vld [vmem:[#allocation5 + $0x738] sm:$0xff] }
  0xa4   :  { %2056 = vmatpush1.bf16.msra.mxu1 %v2055_v42  ;;  %1930 = vmatprep.subr.bf16.mxu0 %v1929_v43  ;;  %v1949_v42 = vpack.c.bf16 %v273_v37, %v269_v36  ;;  %v268_v43 = vld [vmem:[#allocation5 + $0x5c0] sm:$0xff]  ;;  %v313_v36 = vld [vmem:[#allocation5 + $0x728] sm:$0xff]  ;;  %v311_v37 = vld [vmem:[#allocation5 + $0x718] sm:$0xff] }
  0xa5   :  { %2058 = vmatprep.subr.bf16.mxu1 %v2057_v47  ;;  %v274_v47 = vld [vmem:[#allocation5 + $0x5f0] sm:$0xff]  ;;  %v1951_v52 = vpack.c.bf16 %v272_v44, %v268_v43  ;;  %v312_v43 = vld [vmem:[#allocation5 + $0x720] sm:$0xff]  ;;  %v323_v50 = vld [vmem:[#allocation5 + $0x778] sm:$0xff] }
  0xa6   :  { %v310_v44 = vld [vmem:[#allocation5 + $0x710] sm:$0xff]  ;;  %v331_v62 = vld [vmem:[#allocation5 + $0x7b8] sm:$0xff] }
  0xa7   :  { %1932 = vmatpush1.bf16.msra.mxu0 %v1931_v53  ;;  %v2079_v53 = vpack.c.bf16 %v274_v47, %v270_v45  ;;  %v2097_v45 = vpack.c.bf16 %v315_v38, %v311_v37  ;;  %v317_v47 = vld [vmem:[#allocation5 + $0x748] sm:$0xff]  ;;  %v339_v10 = vld [vmem:[#allocation5 + $0x7f8] sm:$0xff] }
  0xa8   :  { %2060 = vmatpush1.bf16.msra.mxu1 %v2059_v25  ;;  %1934 = vmatprep.subr.bf16.mxu0 %v1933_v54  ;;  %v1953_v25 = vpack.c.bf16 %v281_v49, %v277_v48  ;;  %v276_v54 = vld [vmem:[#allocation5 + $0x600] sm:$0xff]  ;;  %v321_v48 = vld [vmem:[#allocation5 + $0x768] sm:$0xff]  ;;  %v319_v49 = vld [vmem:[#allocation5 + $0x758] sm:$0xff] }
  0xa9   :  { %2062 = vmatprep.subr.bf16.mxu1 %v2061_v58  ;;  %v282_v58 = vld [vmem:[#allocation5 + $0x630] sm:$0xff]  ;;  %v1955_v0 = vpack.c.bf16 %v280_v55, %v276_v54  ;;  %v320_v54 = vld [vmem:[#allocation5 + $0x760] sm:$0xff] }
  0xaa   :  { %v318_v55 = vld [vmem:[#allocation5 + $0x750] sm:$0xff]  ;;  %v683_v24 = vld [vmem:[#allocation8 + $0x58] sm:$0xff] }
  0xab   :  { %1936 = vmatpush1.bf16.msra.mxu0 %v1935_v1  ;;  %v2083_v1 = vpack.c.bf16 %v282_v58, %v278_v56  ;;  %v2101_v56 = vpack.c.bf16 %v323_v50, %v319_v49  ;;  %v325_v58 = vld [vmem:[#allocation5 + $0x788] sm:$0xff]  ;;  %v699_v37 = vld [vmem:[#allocation8 + $0xd8] sm:$0xff] }
  0xac   :  { %2064 = vmatpush1.bf16.msra.mxu1 %v2063_v2  ;;  %1938 = vmatprep.subr.bf16.mxu0 %v1937_v3  ;;  %v1957_v2 = vpack.c.bf16 %v289_v60, %v285_v59  ;;  %v284_v3 = vld [vmem:[#allocation5 + $0x640] sm:$0xff]  ;;  %v329_v59 = vld [vmem:[#allocation5 + $0x7a8] sm:$0xff]  ;;  %v327_v60 = vld [vmem:[#allocation5 + $0x798] sm:$0xff] }
  0xad   :  { %2066 = vmatprep.subr.bf16.mxu1 %v2065_v7  ;;  %v290_v7 = vld [vmem:[#allocation5 + $0x670] sm:$0xff]  ;;  %v1959_v13 = vpack.c.bf16 %v288_v4, %v284_v3  ;;  %v328_v3 = vld [vmem:[#allocation5 + $0x7a0] sm:$0xff] }
  0xae   :  { %v326_v4 = vld [vmem:[#allocation5 + $0x790] sm:$0xff]  ;;  %v715_v49 = vld [vmem:[#allocation8 + $0x158] sm:$0xff] }
  0xaf   :  { %1940 = vmatpush1.bf16.msra.mxu0 %v1939_v14  ;;  %v2087_v14 = vpack.c.bf16 %v290_v7, %v286_v5  ;;  %v2105_v5 = vpack.c.bf16 %v331_v62, %v327_v60  ;;  %v333_v7 = vld [vmem:[#allocation5 + $0x7c8] sm:$0xff]  ;;  %v731_v60 = vld [vmem:[#allocation8 + $0x1d8] sm:$0xff] }
  0xb0   :  { %2068 = vmatpush1.bf16.msra.mxu1 %v2067_v15  ;;  %1942 = vmatprep.subr.bf16.mxu0 %v1941_v16  ;;  %v1961_v15 = vpack.c.bf16 %v297_v9, %v293_v8  ;;  %v292_v16 = vld [vmem:[#allocation5 + $0x680] sm:$0xff]  ;;  %v337_v8 = vld [vmem:[#allocation5 + $0x7e8] sm:$0xff]  ;;  %v335_v9 = vld [vmem:[#allocation5 + $0x7d8] sm:$0xff] }
  0xb1   :  { %2070 = vmatprep.subr.bf16.mxu1 %v2069_v20  ;;  %v298_v20 = vld [vmem:[#allocation5 + $0x6b0] sm:$0xff]  ;;  %v1963_v27 = vpack.c.bf16 %v296_v17, %v292_v16  ;;  %v336_v16 = vld [vmem:[#allocation5 + $0x7e0] sm:$0xff] }
  0xb2   :  { %v334_v17 = vld [vmem:[#allocation5 + $0x7d0] sm:$0xff] }
  0xb3   :  { %1944 = vmatpush1.bf16.msra.mxu0 %v1943_v28  ;;  %v2091_v28 = vpack.c.bf16 %v298_v20, %v294_v18  ;;  %v2109_v18 = vpack.c.bf16 %v339_v10, %v335_v9  ;;  %v673_v20 = vld [vmem:[#allocation8 + $0x8] sm:$0xff] }
  0xb4   :  { %2072 = vmatpush1.bf16.msra.mxu1 %v2071_v29  ;;  %1946 = vmatprep.subr.bf16.mxu0 %v1945_v30  ;;  %v1965_v29 = vpack.c.bf16 %v305_v23, %v301_v21  ;;  %v300_v30 = vld [vmem:[#allocation5 + $0x6c0] sm:$0xff]  ;;  %v681_v21 = vld [vmem:[#allocation8 + $0x48] sm:$0xff] }
  0xb5   :  { %2074 = vmatprep.subr.bf16.mxu1 %v2073_v34  ;;  %v306_v34 = vld [vmem:[#allocation5 + $0x6f0] sm:$0xff]  ;;  %v1967_v39 = vpack.c.bf16 %v304_v31, %v300_v30  ;;  %v675_v23 = vld [vmem:[#allocation8 + $0x18] sm:$0xff]  ;;  %v680_v30 = vld [vmem:[#allocation8 + $0x40] sm:$0xff] }
  0xb6   :  { %v674_v31 = vld [vmem:[#allocation8 + $0x10] sm:$0xff] }
  0xb7   :  { %1948 = vmatpush1.bf16.msra.mxu0 %v1947_v40  ;;  %v2095_v40 = vpack.c.bf16 %v306_v34, %v302_v32  ;;  %v2241_v32 = vpack.c.bf16 %v683_v24, %v675_v23  ;;  %v689_v34 = vld [vmem:[#allocation8 + $0x88] sm:$0xff] }
  0xb8   :  { %2076 = vmatpush1.bf16.msra.mxu1 %v2075_v41  ;;  %1950 = vmatprep.subr.bf16.mxu0 %v1949_v42  ;;  %v1969_v41 = vpack.c.bf16 %v313_v36, %v309_v35  ;;  %v308_v42 = vld [vmem:[#allocation5 + $0x700] sm:$0xff]  ;;  %v697_v35 = vld [vmem:[#allocation8 + $0xc8] sm:$0xff] }
  0xb9   :  { %2078 = vmatprep.subr.bf16.mxu1 %v2077_v46  ;;  %v314_v46 = vld [vmem:[#allocation5 + $0x730] sm:$0xff]  ;;  %v1971_v51 = vpack.c.bf16 %v312_v43, %v308_v42  ;;  %v691_v36 = vld [vmem:[#allocation8 + $0x98] sm:$0xff]  ;;  %v696_v42 = vld [vmem:[#allocation8 + $0xc0] sm:$0xff] }
  0xba   :  { %v690_v43 = vld [vmem:[#allocation8 + $0x90] sm:$0xff] }
  0xbb   :  { %1952 = vmatpush1.bf16.msra.mxu0 %v1951_v52  ;;  %v2099_v52 = vpack.c.bf16 %v314_v46, %v310_v44  ;;  %v2245_v44 = vpack.c.bf16 %v699_v37, %v691_v36  ;;  %v705_v46 = vld [vmem:[#allocation8 + $0x108] sm:$0xff] }
  0xbc   :  { %2080 = vmatpush1.bf16.msra.mxu1 %v2079_v53  ;;  %1954 = vmatprep.subr.bf16.mxu0 %v1953_v25  ;;  %v1973_v53 = vpack.c.bf16 %v321_v48, %v317_v47  ;;  %v316_v25 = vld [vmem:[#allocation5 + $0x740] sm:$0xff]  ;;  %v713_v47 = vld [vmem:[#allocation8 + $0x148] sm:$0xff] }
  0xbd   :  { %2082 = vmatprep.subr.bf16.mxu1 %v2081_v57  ;;  %v322_v57 = vld [vmem:[#allocation5 + $0x770] sm:$0xff]  ;;  %v1975_v63 = vpack.c.bf16 %v320_v54, %v316_v25  ;;  %v707_v48 = vld [vmem:[#allocation8 + $0x118] sm:$0xff]  ;;  %v712_v25 = vld [vmem:[#allocation8 + $0x140] sm:$0xff] }
  0xbe   :  { %v706_v54 = vld [vmem:[#allocation8 + $0x110] sm:$0xff] }
  0xbf   :  { %1956 = vmatpush1.bf16.msra.mxu0 %v1955_v0  ;;  %v2103_v0 = vpack.c.bf16 %v322_v57, %v318_v55  ;;  %v2249_v55 = vpack.c.bf16 %v715_v49, %v707_v48  ;;  %v721_v57 = vld [vmem:[#allocation8 + $0x188] sm:$0xff] }
  0xc0   :  { %2084 = vmatpush1.bf16.msra.mxu1 %v2083_v1  ;;  %1958 = vmatprep.subr.bf16.mxu0 %v1957_v2  ;;  %v1977_v1 = vpack.c.bf16 %v329_v59, %v325_v58  ;;  %v324_v2 = vld [vmem:[#allocation5 + $0x780] sm:$0xff]  ;;  %v729_v58 = vld [vmem:[#allocation8 + $0x1c8] sm:$0xff] }
  0xc1   :  { %2086 = vmatprep.subr.bf16.mxu1 %v2085_v6  ;;  %v330_v6 = vld [vmem:[#allocation5 + $0x7b0] sm:$0xff]  ;;  %v1979_v12 = vpack.c.bf16 %v328_v3, %v324_v2  ;;  %v723_v59 = vld [vmem:[#allocation8 + $0x198] sm:$0xff] }
  0xc2   :  { %v722_v2 = vld [vmem:[#allocation8 + $0x190] sm:$0xff]  ;;  %v2253_v3 = vpack.c.bf16 %v731_v60, %v723_v59 }
  0xc3   :  { %1960 = vmatpush1.bf16.msra.mxu0 %v1959_v13  ;;  %v2107_v13 = vpack.c.bf16 %v330_v6, %v326_v4  ;;  %v730_v4 = vld [vmem:[#allocation8 + $0x1d0] sm:$0xff]  ;;  %v745_v6 = vld [vmem:[#allocation8 + $0x248] sm:$0xff] }
  0xc4   :  { %2088 = vmatpush1.bf16.msra.mxu1 %v2087_v14  ;;  %1962 = vmatprep.subr.bf16.mxu0 %v1961_v15  ;;  %v1981_v14 = vpack.c.bf16 %v337_v8, %v333_v7  ;;  %v332_v15 = vld [vmem:[#allocation5 + $0x7c0] sm:$0xff]  ;;  %v2255_v10 = vpack.c.bf16 %v730_v4, %v722_v2  ;;  %v810_v2 = vld [vmem:[#allocation8 + $0x450] sm:$0xff]  ;;  %v825_v4 = vld [vmem:[#allocation8 + $0x4c8] sm:$0xff] }
  0xc5   :  { %2090 = vmatprep.subr.bf16.mxu1 %v2089_v19  ;;  %v338_v19 = vld [vmem:[#allocation5 + $0x7f0] sm:$0xff]  ;;  %v1983_v26 = vpack.c.bf16 %v336_v16, %v332_v15  ;;  %v739_v7 = vld [vmem:[#allocation8 + $0x218] sm:$0xff] }
  0xc6   :  { %v747_v8 = vld [vmem:[#allocation8 + $0x258] sm:$0xff]  ;;  %v738_v15 = vld [vmem:[#allocation8 + $0x210] sm:$0xff] }
  0xc7   :  { %1964 = vmatpush1.bf16.msra.mxu0 %v1963_v27  ;;  %v2111_v27 = vpack.c.bf16 %v338_v19, %v334_v17  ;;  %v2257_v16 = vpack.c.bf16 %v747_v8, %v739_v7  ;;  %v746_v17 = vld [vmem:[#allocation8 + $0x250] sm:$0xff]  ;;  %v761_v19 = vld [vmem:[#allocation8 + $0x2c8] sm:$0xff] }
  0xc8   :  { %2092 = vmatpush1.bf16.msra.mxu1 %v2091_v28  ;;  %1966 = vmatprep.subr.bf16.mxu0 %v1965_v29  ;;  %v2113_v28 = vpack.c.bf16 %v681_v21, %v673_v20  ;;  %v672_v29 = vld [vmem:[#allocation8] sm:$0xff]  ;;  %v755_v20 = vld [vmem:[#allocation8 + $0x298] sm:$0xff]  ;;  %v2259_v24 = vpack.c.bf16 %v746_v17, %v738_v15  ;;  %v826_v15 = vld [vmem:[#allocation8 + $0x4d0] sm:$0xff] }
  0xc9   :  { %2094 = vmatprep.subr.bf16.mxu1 %v2093_v33  ;;  %v682_v33 = vld [vmem:[#allocation8 + $0x50] sm:$0xff]  ;;  %v2115_v38 = vpack.c.bf16 %v680_v30, %v672_v29  ;;  %v763_v21 = vld [vmem:[#allocation8 + $0x2d8] sm:$0xff]  ;;  %v841_v17 = vld [vmem:[#allocation8 + $0x548] sm:$0xff] }
  0xca   :  { %v754_v29 = vld [vmem:[#allocation8 + $0x290] sm:$0xff]  ;;  %v2261_v30 = vpack.c.bf16 %v763_v21, %v755_v20 }
  0xcb   :  { %1968 = vmatpush1.bf16.msra.mxu0 %v1967_v39  ;;  %v2243_v39 = vpack.c.bf16 %v682_v33, %v674_v31  ;;  %v762_v31 = vld [vmem:[#allocation8 + $0x2d0] sm:$0xff]  ;;  %v777_v33 = vld [vmem:[#allocation8 + $0x348] sm:$0xff] }
  0xcc   :  { %2096 = vmatpush1.bf16.msra.mxu1 %v2095_v40  ;;  %1970 = vmatprep.subr.bf16.mxu0 %v1969_v41  ;;  %v2117_v40 = vpack.c.bf16 %v697_v35, %v689_v34  ;;  %v688_v41 = vld [vmem:[#allocation8 + $0x80] sm:$0xff]  ;;  %v771_v34 = vld [vmem:[#allocation8 + $0x318] sm:$0xff]  ;;  %v2263_v37 = vpack.c.bf16 %v762_v31, %v754_v29  ;;  %v842_v29 = vld [vmem:[#allocation8 + $0x550] sm:$0xff] }
  0xcd   :  { %2098 = vmatprep.subr.bf16.mxu1 %v2097_v45  ;;  %v698_v45 = vld [vmem:[#allocation8 + $0xd0] sm:$0xff]  ;;  %v2119_v50 = vpack.c.bf16 %v696_v42, %v688_v41  ;;  %v779_v35 = vld [vmem:[#allocation8 + $0x358] sm:$0xff]  ;;  %v857_v31 = vld [vmem:[#allocation8 + $0x5c8] sm:$0xff] }
  0xce   :  { %v770_v41 = vld [vmem:[#allocation8 + $0x310] sm:$0xff]  ;;  %v2265_v42 = vpack.c.bf16 %v779_v35, %v771_v34 }
  0xcf   :  { %1972 = vmatpush1.bf16.msra.mxu0 %v1971_v51  ;;  %v2247_v51 = vpack.c.bf16 %v698_v45, %v690_v43  ;;  %v778_v43 = vld [vmem:[#allocation8 + $0x350] sm:$0xff]  ;;  %v793_v45 = vld [vmem:[#allocation8 + $0x3c8] sm:$0xff] }
  0xd0   :  { %2100 = vmatpush1.bf16.msra.mxu1 %v2099_v52  ;;  %1974 = vmatprep.subr.bf16.mxu0 %v1973_v53  ;;  %v2121_v52 = vpack.c.bf16 %v713_v47, %v705_v46  ;;  %v704_v53 = vld [vmem:[#allocation8 + $0x100] sm:$0xff]  ;;  %v787_v46 = vld [vmem:[#allocation8 + $0x398] sm:$0xff]  ;;  %v2267_v49 = vpack.c.bf16 %v778_v43, %v770_v41  ;;  %v858_v41 = vld [vmem:[#allocation8 + $0x5d0] sm:$0xff] }
  0xd1   :  { %2102 = vmatprep.subr.bf16.mxu1 %v2101_v56  ;;  %v714_v56 = vld [vmem:[#allocation8 + $0x150] sm:$0xff]  ;;  %v2123_v62 = vpack.c.bf16 %v712_v25, %v704_v53  ;;  %v795_v47 = vld [vmem:[#allocation8 + $0x3d8] sm:$0xff]  ;;  %v873_v43 = vld [vmem:[#allocation8 + $0x648] sm:$0xff] }
  0xd2   :  { %v786_v53 = vld [vmem:[#allocation8 + $0x390] sm:$0xff]  ;;  %v2269_v25 = vpack.c.bf16 %v795_v47, %v787_v46 }
  0xd3   :  { %1976 = vmatpush1.bf16.msra.mxu0 %v1975_v63  ;;  %v2125_v63 = vpack.c.bf16 %v729_v58, %v721_v57  ;;  %v803_v57 = vld [vmem:[#allocation8 + $0x418] sm:$0xff] }
  0xd4   :  { %2104 = vmatpush1.bf16.msra.mxu1 %v2103_v0  ;;  %1978 = vmatprep.subr.bf16.mxu0 %v1977_v1  ;;  %v720_v0 = vld [vmem:[#allocation8 + $0x180] sm:$0xff]  ;;  %v811_v58 = vld [vmem:[#allocation8 + $0x458] sm:$0xff] }
  0xd5   :  { %2106 = vmatprep.subr.bf16.mxu1 %v2105_v5  ;;  %v728_v1 = vld [vmem:[#allocation8 + $0x1c0] sm:$0xff]  ;;  %v737_v5 = vld [vmem:[#allocation8 + $0x208] sm:$0xff] }
  0xd6   :  { %v2127_v9 = vpack.c.bf16 %v728_v1, %v720_v0  ;;  %v802_v0 = vld [vmem:[#allocation8 + $0x410] sm:$0xff]  ;;  %v2273_v1 = vpack.c.bf16 %v811_v58, %v803_v57 }
  0xd7   :  { %1980 = vmatpush1.bf16.msra.mxu0 %v1979_v12  ;;  %v2129_v12 = vpack.c.bf16 %v745_v6, %v737_v5  ;;  %v819_v5 = vld [vmem:[#allocation8 + $0x498] sm:$0xff]  ;;  %v2275_v8 = vpack.c.bf16 %v810_v2, %v802_v0  ;;  %v890_v0 = vld [vmem:[#allocation8 + $0x6d0] sm:$0xff]  ;;  %v905_v2 = vld [vmem:[#allocation8 + $0x748] sm:$0xff] }
  0xd8   :  { %2108 = vmatpush1.bf16.msra.mxu1 %v2107_v13  ;;  %1982 = vmatprep.subr.bf16.mxu0 %v1981_v14  ;;  %v736_v13 = vld [vmem:[#allocation8 + $0x200] sm:$0xff]  ;;  %v827_v6 = vld [vmem:[#allocation8 + $0x4d8] sm:$0xff] }
  0xd9   :  { %2110 = vmatprep.subr.bf16.mxu1 %v2109_v18  ;;  %v744_v14 = vld [vmem:[#allocation8 + $0x240] sm:$0xff]  ;;  %v753_v18 = vld [vmem:[#allocation8 + $0x288] sm:$0xff] }
  0xda   :  { %v2131_v23 = vpack.c.bf16 %v744_v14, %v736_v13  ;;  %v818_v13 = vld [vmem:[#allocation8 + $0x490] sm:$0xff]  ;;  %v2277_v14 = vpack.c.bf16 %v827_v6, %v819_v5 }
  0xdb   :  { %1984 = vmatpush1.bf16.msra.mxu0 %v1983_v26  ;;  %v2133_v26 = vpack.c.bf16 %v761_v19, %v753_v18  ;;  %v835_v18 = vld [vmem:[#allocation8 + $0x518] sm:$0xff]  ;;  %v2279_v21 = vpack.c.bf16 %v826_v15, %v818_v13  ;;  %v906_v13 = vld [vmem:[#allocation8 + $0x750] sm:$0xff] }
  0xdc   :  { %2112 = vmatpush1.bf16.msra.mxu1 %v2111_v27  ;;  %2114 = vmatprep.subr.bf16.mxu0 %v2113_v28  ;;  %v752_v27 = vld [vmem:[#allocation8 + $0x280] sm:$0xff]  ;;  %v843_v19 = vld [vmem:[#allocation8 + $0x558] sm:$0xff] }
  0xdd   :  { %2242 = vmatprep.subr.bf16.mxu1 %v2241_v32  ;;  %v760_v28 = vld [vmem:[#allocation8 + $0x2c0] sm:$0xff]  ;;  %v769_v32 = vld [vmem:[#allocation8 + $0x308] sm:$0xff] }
  0xde   :  { %520 = vmatmul.mubr.f32.vlgmr.msra.gmra.mrb[0].mxu0 %v2918_v22  ;;  %v2135_v36 = vpack.c.bf16 %v760_v28, %v752_v27  ;;  %v834_v27 = vld [vmem:[#allocation8 + $0x510] sm:$0xff]  ;;  %v2281_v28 = vpack.c.bf16 %v843_v19, %v835_v18  ;;  %v915_v18 = vld [vmem:[#allocation8 + $0x798] sm:$0xff] }
  0xdf   :  { %662 = vmatmul.mubr.f32.vlgmr.msra.gmra.mrb[0].mxu1 %v2918_v22  ;;  %2116 = vmatpush1.bf16.msra.mxu0 %v2115_v38  ;;  %v2251_v22 = vpack.c.bf16 %v714_v56, %v706_v54  ;;  %v2137_v38 = vpack.c.bf16 %v777_v33, %v769_v32  ;;  %v794_v54 = vld [vmem:[#allocation8 + $0x3d0] sm:$0xff]  ;;  %v809_v56 = vld [vmem:[#allocation8 + $0x448] sm:$0xff]  ;;  %v851_v32 = vld [vmem:[#allocation8 + $0x598] sm:$0xff]  ;;  %v2283_v35 = vpack.c.bf16 %v842_v29, %v834_v27 }
  0xe0   :  { %2244 = vmatpush1.bf16.msra.mxu1 %v2243_v39  ;;  %2118 = vmatprep.subr.bf16.mxu0 %v2117_v40  ;;  %v768_v39 = vld [vmem:[#allocation8 + $0x300] sm:$0xff]  ;;  %v2271_v60 = vpack.c.bf16 %v794_v54, %v786_v53  ;;  %v859_v33 = vld [vmem:[#allocation8 + $0x5d8] sm:$0xff]  ;;  %v874_v53 = vld [vmem:[#allocation8 + $0x650] sm:$0xff] }
  0xe1   :  { %2246 = vmatprep.subr.bf16.mxu1 %v2245_v44  ;;  %v776_v40 = vld [vmem:[#allocation8 + $0x340] sm:$0xff]  ;;  %v785_v44 = vld [vmem:[#allocation8 + $0x388] sm:$0xff]  ;;  %v914_v27 = vld [vmem:[#allocation8 + $0x790] sm:$0xff] }
  0xe2   :  { %v2139_v48 = vpack.c.bf16 %v776_v40, %v768_v39  ;;  %v850_v39 = vld [vmem:[#allocation8 + $0x590] sm:$0xff]  ;;  %v2285_v40 = vpack.c.bf16 %v859_v33, %v851_v32  ;;  %v889_v54 = vld [vmem:[#allocation8 + $0x6c8] sm:$0xff]  ;;  %v931_v32 = vld [vmem:[#allocation8 + $0x818] sm:$0xff] }
  0xe3   :  { %2120 = vmatpush1.bf16.msra.mxu0 %v2119_v50  ;;  %v2141_v50 = vpack.c.bf16 %v793_v45, %v785_v44  ;;  %v867_v44 = vld [vmem:[#allocation8 + $0x618] sm:$0xff]  ;;  %v2287_v47 = vpack.c.bf16 %v858_v41, %v850_v39  ;;  %v356_v39 = vsub.s32 3, %v2902_v61 }
  0xe4   :  { %2248 = vmatpush1.bf16.msra.mxu1 %v2247_v51  ;;  %2122 = vmatprep.subr.bf16.mxu0 %v2121_v52  ;;  %v784_v51 = vld [vmem:[#allocation8 + $0x380] sm:$0xff]  ;;  %v875_v45 = vld [vmem:[#allocation8 + $0x658] sm:$0xff] }
  0xe5   :  { %2250 = vmatprep.subr.bf16.mxu1 %v2249_v55  ;;  %v792_v52 = vld [vmem:[#allocation8 + $0x3c0] sm:$0xff]  ;;  %v801_v55 = vld [vmem:[#allocation8 + $0x408] sm:$0xff] }
  0xe6   :  { %v2143_v59 = vpack.c.bf16 %v792_v52, %v784_v51  ;;  %v866_v51 = vld [vmem:[#allocation8 + $0x610] sm:$0xff]  ;;  %v2289_v52 = vpack.c.bf16 %v875_v45, %v867_v44  ;;  %v928_v44 = vld [vmem:[#allocation8 + $0x800] sm:$0xff] }
  0xe7   :  { %2124 = vmatpush1.bf16.msra.mxu0 %v2123_v62  ;;  %v2145_v62 = vpack.c.bf16 %v809_v56, %v801_v55  ;;  %v883_v55 = vld [vmem:[#allocation8 + $0x698] sm:$0xff]  ;;  %v2291_v58 = vpack.c.bf16 %v874_v53, %v866_v51  ;;  %v945_v53 = vld [vmem:[#allocation8 + $0x888] sm:$0xff] }
  0xe8   :  { %2252 = vmatpush1.bf16.msra.mxu1 %v2251_v22  ;;  %2126 = vmatprep.subr.bf16.mxu0 %v2125_v63  ;;  %v800_v22 = vld [vmem:[#allocation8 + $0x400] sm:$0xff]  ;;  %v891_v56 = vld [vmem:[#allocation8 + $0x6d8] sm:$0xff] }
  0xe9   :  { %2254 = vmatprep.subr.bf16.mxu1 %v2253_v3  ;;  %v808_v63 = vld [vmem:[#allocation8 + $0x440] sm:$0xff]  ;;  %v817_v3 = vld [vmem:[#allocation8 + $0x488] sm:$0xff] }
  0xea   :  { %v2147_v7 = vpack.c.bf16 %v808_v63, %v800_v22  ;;  %v882_v22 = vld [vmem:[#allocation8 + $0x690] sm:$0xff]  ;;  %v2293_v63 = vpack.c.bf16 %v891_v56, %v883_v55  ;;  %v947_v55 = vld [vmem:[#allocation8 + $0x898] sm:$0xff] }
  0xeb   :  { %2128 = vmatpush1.bf16.msra.mxu0 %v2127_v9  ;;  %v2149_v9 = vpack.c.bf16 %v825_v4, %v817_v3  ;;  %v899_v3 = vld [vmem:[#allocation8 + $0x718] sm:$0xff]  ;;  %v2295_v6 = vpack.c.bf16 %v890_v0, %v882_v22  ;;  %v954_v0 = vld [vmem:[#allocation8 + $0x8d0] sm:$0xff] }
  0xec   :  { %2256 = vmatpush1.bf16.msra.mxu1 %v2255_v10  ;;  %2130 = vmatprep.subr.bf16.mxu0 %v2129_v12  ;;  %v816_v10 = vld [vmem:[#allocation8 + $0x480] sm:$0xff]  ;;  %v907_v4 = vld [vmem:[#allocation8 + $0x758] sm:$0xff] }
  0xed   :  { %2258 = vmatprep.subr.bf16.mxu1 %v2257_v16  ;;  %v824_v12 = vld [vmem:[#allocation8 + $0x4c0] sm:$0xff]  ;;  %v833_v16 = vld [vmem:[#allocation8 + $0x508] sm:$0xff]  ;;  %v955_v56 = vld [vmem:[#allocation8 + $0x8d8] sm:$0xff] }
  0xee   :  { %v2151_v20 = vpack.c.bf16 %v824_v12, %v816_v10  ;;  %v2297_v10 = vpack.c.bf16 %v907_v4, %v899_v3  ;;  %v898_v12 = vld [vmem:[#allocation8 + $0x710] sm:$0xff]  ;;  %v2309_v3 = vpack.c.bf16 %v955_v56, %v947_v55  ;;  %v969_v4 = vld [vmem:[#allocation8 + $0x948] sm:$0xff] }
  0xef   :  { %2132 = vmatpush1.bf16.msra.mxu0 %v2131_v23  ;;  %v2153_v23 = vpack.c.bf16 %v841_v17, %v833_v16  ;;  %v2299_v15 = vpack.c.bf16 %v906_v13, %v898_v12  ;;  %v913_v16 = vld [vmem:[#allocation8 + $0x788] sm:$0xff]  ;;  %v968_v12 = vld [vmem:[#allocation8 + $0x940] sm:$0xff] }
  0xf0   :  { %2260 = vmatpush1.bf16.msra.mxu1 %v2259_v24  ;;  %2134 = vmatprep.subr.bf16.mxu0 %v2133_v26  ;;  %v832_v24 = vld [vmem:[#allocation8 + $0x500] sm:$0xff]  ;;  %v921_v17 = vld [vmem:[#allocation8 + $0x7c8] sm:$0xff] }
  0xf1   :  { %2262 = vmatprep.subr.bf16.mxu1 %v2261_v30  ;;  %v840_v26 = vld [vmem:[#allocation8 + $0x540] sm:$0xff]  ;;  %v849_v30 = vld [vmem:[#allocation8 + $0x588] sm:$0xff]  ;;  %v2173_v19 = vpack.c.bf16 %v921_v17, %v913_v16  ;;  %v970_v16 = vld [vmem:[#allocation8 + $0x950] sm:$0xff] }
  0xf2   :  { %v2155_v34 = vpack.c.bf16 %v840_v26, %v832_v24  ;;  %v977_v17 = vld [vmem:[#allocation8 + $0x988] sm:$0xff] }
  0xf3   :  { %2136 = vmatpush1.bf16.msra.mxu0 %v2135_v36  ;;  %v2157_v36 = vpack.c.bf16 %v857_v31, %v849_v30  ;;  %v929_v30 = vld [vmem:[#allocation8 + $0x808] sm:$0xff] }
  0xf4   :  { %2264 = vmatpush1.bf16.msra.mxu1 %v2263_v37  ;;  %2138 = vmatprep.subr.bf16.mxu0 %v2137_v38  ;;  %v848_v37 = vld [vmem:[#allocation8 + $0x580] sm:$0xff]  ;;  %v937_v31 = vld [vmem:[#allocation8 + $0x848] sm:$0xff] }
  0xf5   :  { %2266 = vmatprep.subr.bf16.mxu1 %v2265_v42  ;;  %v856_v38 = vld [vmem:[#allocation8 + $0x5c0] sm:$0xff]  ;;  %v865_v42 = vld [vmem:[#allocation8 + $0x608] sm:$0xff]  ;;  %v2177_v33 = vpack.c.bf16 %v937_v31, %v929_v30  ;;  %v986_v30 = vld [vmem:[#allocation8 + $0x9d0] sm:$0xff] }
  0xf6   :  { %v2159_v46 = vpack.c.bf16 %v856_v38, %v848_v37  ;;  %v2927_v37 = vld [vmem:[#allocation7] sm:$0xf]  ;;  %v348_v38 = vsub.s32 1, %v2902_v61  ;;  %v993_v31 = vld [vmem:[#allocation8 + $0xa08] sm:$0xff] }
  0xf7   :  { %2140 = vmatpush1.bf16.msra.mxu0 %v2139_v48  ;;  %v2161_v48 = vpack.c.bf16 %v873_v43, %v865_v42  ;;  %v357_v42 = vrot.slane %v2927_v37, %v356_v39 }
  0xf8   :  { %2268 = vmatpush1.bf16.msra.mxu1 %v2267_v49  ;;  %2142 = vmatprep.subr.bf16.mxu0 %v2141_v50  ;;  %v864_v49 = vld [vmem:[#allocation8 + $0x600] sm:$0xff]  ;;  %v349_v41 = vrot.slane %v2927_v37, %v348_v38 }
  0xf9   :  { %2270 = vmatprep.subr.bf16.mxu1 %v2269_v25  ;;  %v872_v50 = vld [vmem:[#allocation8 + $0x640] sm:$0xff]  ;;  %v881_v25 = vld [vmem:[#allocation8 + $0x688] sm:$0xff] }
  0xfa   :  { %v2163_v57 = vpack.c.bf16 %v872_v50, %v864_v49  ;;  %v930_v49 = vld [vmem:[#allocation8 + $0x810] sm:$0xff] }
  0xfb   :  { %2144 = vmatpush1.bf16.msra.mxu0 %v2143_v59  ;;  %v2165_v59 = vpack.c.bf16 %v889_v54, %v881_v25  ;;  %v938_v50 = vld [vmem:[#allocation8 + $0x850] sm:$0xff]  ;;  %v953_v54 = vld [vmem:[#allocation8 + $0x8c8] sm:$0xff] }
  0xfc   :  { %2272 = vmatpush1.bf16.msra.mxu1 %v2271_v60  ;;  %2146 = vmatprep.subr.bf16.mxu0 %v2145_v62  ;;  %v880_v60 = vld [vmem:[#allocation8 + $0x680] sm:$0xff] }
  0xfd   :  { %2274 = vmatprep.subr.bf16.mxu1 %v2273_v1  ;;  %v888_v62 = vld [vmem:[#allocation8 + $0x6c0] sm:$0xff]  ;;  %v897_v1 = vld [vmem:[#allocation8 + $0x708] sm:$0xff] }
  0xfe   :  { %v2167_v5 = vpack.c.bf16 %v888_v62, %v880_v60  ;;  %v944_v60 = vld [vmem:[#allocation8 + $0x880] sm:$0xff] }
  0xff   :  { %2148 = vmatpush1.bf16.msra.mxu0 %v2147_v7  ;;  %v2169_v7 = vpack.c.bf16 %v905_v2, %v897_v1  ;;  %v952_v62 = vld [vmem:[#allocation8 + $0x8c0] sm:$0xff]  ;;  %v961_v1 = vld [vmem:[#allocation8 + $0x908] sm:$0xff]  ;;  %v2181_v2 = vpack.c.bf16 %v953_v54, %v945_v53 }
 0x100   :  { %2276 = vmatpush1.bf16.msra.mxu1 %v2275_v8  ;;  %2150 = vmatprep.subr.bf16.mxu0 %v2149_v9  ;;  %v896_v8 = vld [vmem:[#allocation8 + $0x700] sm:$0xff]  ;;  %v2185_v13 = vpack.c.bf16 %v969_v4, %v961_v1 }
 0x101   :  { %2278 = vmatprep.subr.bf16.mxu1 %v2277_v14  ;;  %v904_v9 = vld [vmem:[#allocation8 + $0x740] sm:$0xff] }
 0x102   :  { %v2171_v14 = vpack.c.bf16 %v904_v9, %v896_v8  ;;  %v2183_v8 = vpack.c.bf16 %v952_v62, %v944_v60  ;;  %v1016_v54 = vld [vmem:[#allocation8 + $0xac0] sm:$0xff]  ;;  %v1025_v60 = vld [vmem:[#allocation8 + $0xb08] sm:$0xff] }
 0x103   :  { %2152 = vmatpush1.bf16.msra.mxu0 %v2151_v20  ;;  %v923_v20 = vld [vmem:[#allocation8 + $0x7d8] sm:$0xff]  ;;  %v1033_v62 = vld [vmem:[#allocation8 + $0xb48] sm:$0xff]  ;;  %v1032_v4 = vld [vmem:[#allocation8 + $0xb40] sm:$0xff] }
 0x104   :  { %2280 = vmatpush1.bf16.msra.mxu1 %v2279_v21  ;;  %2154 = vmatprep.subr.bf16.mxu0 %v2153_v23  ;;  %v912_v21 = vld [vmem:[#allocation8 + $0x780] sm:$0xff]  ;;  %v2301_v24 = vpack.c.bf16 %v923_v20, %v915_v18  ;;  %v985_v18 = vld [vmem:[#allocation8 + $0x9c8] sm:$0xff]  ;;  %v987_v20 = vld [vmem:[#allocation8 + $0x9d8] sm:$0xff] }
 0x105   :  { %2282 = vmatprep.subr.bf16.mxu1 %v2281_v28  ;;  %v920_v23 = vld [vmem:[#allocation8 + $0x7c0] sm:$0xff]  ;;  %v922_v28 = vld [vmem:[#allocation8 + $0x7d0] sm:$0xff] }
 0x106   :  { %v2175_v26 = vpack.c.bf16 %v920_v23, %v912_v21  ;;  %v2303_v29 = vpack.c.bf16 %v922_v28, %v914_v27  ;;  %v2189_v27 = vpack.c.bf16 %v985_v18, %v977_v17  ;;  %v1040_v17 = vld [vmem:[#allocation8 + $0xb80] sm:$0xff] }
 0x107   :  { %2156 = vmatpush1.bf16.msra.mxu0 %v2155_v34  ;;  %v939_v34 = vld [vmem:[#allocation8 + $0x858] sm:$0xff]  ;;  %v1048_v18 = vld [vmem:[#allocation8 + $0xbc0] sm:$0xff] }
 0x108   :  { %2284 = vmatpush1.bf16.msra.mxu1 %v2283_v35  ;;  %2158 = vmatprep.subr.bf16.mxu0 %v2157_v36  ;;  %v2305_v35 = vpack.c.bf16 %v939_v34, %v931_v32  ;;  %v344_v36 = vsub.s32 0, %v2902_v61  ;;  %v1001_v32 = vld [vmem:[#allocation8 + $0xa48] sm:$0xff]  ;;  %v1003_v34 = vld [vmem:[#allocation8 + $0xa58] sm:$0xff] }
 0x109   :  { %2286 = vmatprep.subr.bf16.mxu1 %v2285_v40 }
 0x10a   :  { %v345_v40 = vrot.slane %v2927_v37, %v344_v36 }
 0x10b   :  { %2160 = vmatpush1.bf16.msra.mxu0 %v2159_v46 }
 0x10c   :  { %2288 = vmatpush1.bf16.msra.mxu1 %v2287_v47  ;;  %2162 = vmatprep.subr.bf16.mxu0 %v2161_v48  ;;  %v936_v48 = vld [vmem:[#allocation8 + $0x840] sm:$0xff] }
 0x10d   :  { %2290 = vmatprep.subr.bf16.mxu1 %v2289_v52 }
 0x10f   :  { %2164 = vmatpush1.bf16.msra.mxu0 %v2163_v57 }
 0x110   :  { %2292 = vmatpush1.bf16.msra.mxu1 %v2291_v58  ;;  %2166 = vmatprep.subr.bf16.mxu0 %v2165_v59  ;;  %v2179_v58 = vpack.c.bf16 %v936_v48, %v928_v44  ;;  %v2307_v59 = vpack.c.bf16 %v938_v50, %v930_v49  ;;  %v1009_v48 = vld [vmem:[#allocation8 + $0xa88] sm:$0xff]  ;;  %v1011_v50 = vld [vmem:[#allocation8 + $0xa98] sm:$0xff] }
 0x111   :  { %2294 = vmatprep.subr.bf16.mxu1 %v2293_v63  ;;  %v946_v63 = vld [vmem:[#allocation8 + $0x890] sm:$0xff]  ;;  %v1017_v49 = vld [vmem:[#allocation8 + $0xac8] sm:$0xff] }
 0x112   :  { %v2311_v9 = vpack.c.bf16 %v954_v0, %v946_v63  ;;  %v2197_v55 = vpack.c.bf16 %v1017_v49, %v1009_v48  ;;  %v1027_v63 = vld [vmem:[#allocation8 + $0xb18] sm:$0xff]  ;;  %v1072_v48 = vld [vmem:[#allocation8 + $0xc80] sm:$0xff] }
 0x113   :  { %2168 = vmatpush1.bf16.msra.mxu0 %v2167_v5  ;;  %v963_v5 = vld [vmem:[#allocation8 + $0x918] sm:$0xff]  ;;  %v1080_v49 = vld [vmem:[#allocation8 + $0xcc0] sm:$0xff] }
 0x114   :  { %2296 = vmatpush1.bf16.msra.mxu1 %v2295_v6  ;;  %2170 = vmatprep.subr.bf16.mxu0 %v2169_v7  ;;  %v971_v6 = vld [vmem:[#allocation8 + $0x958] sm:$0xff] }
 0x115   :  { %2298 = vmatprep.subr.bf16.mxu1 %v2297_v10  ;;  %v960_v10 = vld [vmem:[#allocation8 + $0x900] sm:$0xff]  ;;  %v1035_v0 = vld [vmem:[#allocation8 + $0xb58] sm:$0xff] }
 0x116   :  { %v2187_v21 = vpack.c.bf16 %v968_v12, %v960_v10  ;;  %v1041_v10 = vld [vmem:[#allocation8 + $0xb88] sm:$0xff] }
 0x117   :  { %2172 = vmatpush1.bf16.msra.mxu0 %v2171_v14  ;;  %v2313_v14 = vpack.c.bf16 %v971_v6, %v963_v5  ;;  %v2201_v5 = vpack.c.bf16 %v1033_v62, %v1025_v60  ;;  %v2329_v6 = vpack.c.bf16 %v1035_v0, %v1027_v63  ;;  %v1049_v12 = vld [vmem:[#allocation8 + $0xbc8] sm:$0xff]  ;;  %v1088_v60 = vld [vmem:[#allocation8 + $0xd00] sm:$0xff] }
 0x118   :  { %2300 = vmatpush1.bf16.msra.mxu1 %v2299_v15  ;;  %2174 = vmatprep.subr.bf16.mxu0 %v2173_v19  ;;  %v962_v15 = vld [vmem:[#allocation8 + $0x910] sm:$0xff]  ;;  %v979_v19 = vld [vmem:[#allocation8 + $0x998] sm:$0xff]  ;;  %v1096_v62 = vld [vmem:[#allocation8 + $0xd40] sm:$0xff] }
 0x119   :  { %2302 = vmatprep.subr.bf16.mxu1 %v2301_v24  ;;  %v2315_v23 = vpack.c.bf16 %v970_v16, %v962_v15  ;;  %v976_v24 = vld [vmem:[#allocation8 + $0x980] sm:$0xff]  ;;  %v2317_v28 = vpack.c.bf16 %v987_v20, %v979_v19  ;;  %v2205_v19 = vpack.c.bf16 %v1049_v12, %v1041_v10 }
 0x11a   :  { %v1104_v10 = vld [vmem:[#allocation8 + $0xd80] sm:$0xff] }
 0x11b   :  { %2176 = vmatpush1.bf16.msra.mxu0 %v2175_v26  ;;  %v984_v26 = vld [vmem:[#allocation8 + $0x9c0] sm:$0xff] }
 0x11c   :  { %2304 = vmatpush1.bf16.msra.mxu1 %v2303_v29  ;;  %2178 = vmatprep.subr.bf16.mxu0 %v2177_v33  ;;  %v978_v29 = vld [vmem:[#allocation8 + $0x990] sm:$0xff]  ;;  %v995_v33 = vld [vmem:[#allocation8 + $0xa18] sm:$0xff]  ;;  %v1112_v12 = vld [vmem:[#allocation8 + $0xdc0] sm:$0xff] }
 0x11d   :  { %2306 = vmatprep.subr.bf16.mxu1 %v2305_v35  ;;  %v2191_v35 = vpack.c.bf16 %v984_v26, %v976_v24  ;;  %v2321_v44 = vpack.c.bf16 %v1003_v34, %v995_v33  ;;  %v1057_v24 = vld [vmem:[#allocation8 + $0xc08] sm:$0xff] }
 0x11e   :  { %v1065_v26 = vld [vmem:[#allocation8 + $0xc48] sm:$0xff] }
 0x11f   :  { %v2209_v33 = vpack.c.bf16 %v1065_v26, %v1057_v24  ;;  %v1120_v24 = vld [vmem:[#allocation8 + $0xe00] sm:$0xff] }
 0x120   :  { %v1128_v26 = vld [vmem:[#allocation8 + $0xe40] sm:$0xff] }
 0x1b1   :  { %v521_v43 = vpop.f32.mrb[0].mxu0 }
 0x1b2   :  { %v2625_v45 = vadd.f32 %v521_v43, %v345_v40  ;;  %v2940_v46 = vpop.f32.mrb[0].mxu1  ;;  %v523_v47 = vpop.f32.mrb[1].mxu0  ;;  %v2319_v40 = vpack.c.bf16 %v986_v30, %v978_v29  ;;  %v2193_v43 = vpack.c.bf16 %v1001_v32, %v993_v31  ;;  %v2207_v29 = vpack.c.bf16 %v1048_v18, %v1040_v17  ;;  %v1056_v31 = vld [vmem:[#allocation8 + $0xc00] sm:$0xff]  ;;  %v1121_v17 = vld [vmem:[#allocation8 + $0xe08] sm:$0xff] }
 0x1b3   :  { %v2626_v51 = vadd.f32 %v523_v47, %v349_v41  ;;  %v665_v52 = vpop.f32.mrb[1].mxu1  ;;  %v992_v41 = vld [vmem:[#allocation8 + $0xa00] sm:$0xff]  ;;  %v1002_v47 = vld [vmem:[#allocation8 + $0xa50] sm:$0xff]  ;;  %v1129_v18 = vld [vmem:[#allocation8 + $0xe48] sm:$0xff] }
 0x1b4   :  { %v2628_v25 = vadd.f32 %v665_v52, %v357_v42  ;;  %v2944_v22 = vmax.f32 %v2625_v45, 0.0  ;;  %v1000_v42 = vld [vmem:[#allocation8 + $0xa40] sm:$0xff]  ;;  %v994_v45 = vld [vmem:[#allocation8 + $0xa10] sm:$0xff] }
 0x1b5   :  { %v2942_v57 = vmax.f32 %v2626_v51, 0.0  ;;  %v1019_v51 = vld [vmem:[#allocation8 + $0xad8] sm:$0xff]  ;;  %v2195_v52 = vpack.c.bf16 %v1000_v42, %v992_v41  ;;  %v2323_v53 = vpack.c.bf16 %v1002_v47, %v994_v45  ;;  %v1064_v32 = vld [vmem:[#allocation8 + $0xc40] sm:$0xff]  ;;  %v1073_v41 = vld [vmem:[#allocation8 + $0xc88] sm:$0xff] }
 0x1b6   :  { %v2948_v7 = vmax.f32 %v2628_v25, 0.0  ;;  %v1008_v25 = vld [vmem:[#allocation8 + $0xa80] sm:$0xff]  ;;  %v2325_v56 = vpack.c.bf16 %v1019_v51, %v1011_v50  ;;  %v1081_v42 = vld [vmem:[#allocation8 + $0xcc8] sm:$0xff]  ;;  %v2211_v45 = vpack.c.bf16 %v1064_v32, %v1056_v31 }
 0x1b7   :  { %1290 = vmatprep.mubr.f32.mxu0 %v2942_v57  ;;  %1432 = vmatprep.mubr.f32.mxu1 %v2942_v57  ;;  %v2199_v1 = vpack.c.bf16 %v1016_v54, %v1008_v25  ;;  %v2213_v50 = vpack.c.bf16 %v1081_v42, %v1073_v41  ;;  %v1089_v25 = vld [vmem:[#allocation8 + $0xd08] sm:$0xff]  ;;  %v1136_v41 = vld [vmem:[#allocation8 + $0xe80] sm:$0xff] }
 0x1b8   :  { %1291 = vmatmul.mubr.f32.vlgmr.msra.gmra.mrb[2].mxu0 %v2944_v22  ;;  %1433 = vmatmul.mubr.f32.vlgmr.msra.gmra.mrb[2].mxu1 %v2944_v22  ;;  %v1097_v54 = vld [vmem:[#allocation8 + $0xd48] sm:$0xff]  ;;  %v1144_v42 = vld [vmem:[#allocation8 + $0xec0] sm:$0xff] }
 0x1b9   :  { %2180 = vmatpush1.bf16.msra.mxu0 %v2179_v58  ;;  %2308 = vmatpush1.bf16.msra.mxu1 %v2307_v59  ;;  %v1010_v58 = vld [vmem:[#allocation8 + $0xa90] sm:$0xff]  ;;  %v2217_v63 = vpack.c.bf16 %v1097_v54, %v1089_v25  ;;  %v1137_v31 = vld [vmem:[#allocation8 + $0xe88] sm:$0xff]  ;;  %v1152_v25 = vld [vmem:[#allocation8 + $0xf00] sm:$0xff] }
 0x1ba   :  { %1361 = vmatprep.mubr.f32.mxu0 %v2948_v7  ;;  %1503 = vmatprep.mubr.f32.mxu1 %v2948_v7  ;;  %v1018_v59 = vld [vmem:[#allocation8 + $0xad0] sm:$0xff]  ;;  %v1145_v32 = vld [vmem:[#allocation8 + $0xec8] sm:$0xff]  ;;  %v1160_v54 = vld [vmem:[#allocation8 + $0xf40] sm:$0xff] }
 0x1bb   :  { %2182 = vmatprep.subr.bf16.mxu0 %v2181_v2  ;;  %2310 = vmatprep.subr.bf16.mxu1 %v2309_v3  ;;  %v2327_v2 = vpack.c.bf16 %v1018_v59, %v1010_v58  ;;  %v1024_v3 = vld [vmem:[#allocation8 + $0xb00] sm:$0xff]  ;;  %v2215_v58 = vpack.c.bf16 %v1080_v49, %v1072_v48  ;;  %v1153_v48 = vld [vmem:[#allocation8 + $0xf08] sm:$0xff] }
 0x1bc   :  { %v2203_v15 = vpack.c.bf16 %v1032_v4, %v1024_v3  ;;  %v1105_v3 = vld [vmem:[#allocation8 + $0xd88] sm:$0xff] }
 0x1bd   :  { %2184 = vmatpush1.bf16.msra.mxu0 %v2183_v8  ;;  %2312 = vmatpush1.bf16.msra.mxu1 %v2311_v9  ;;  %v1026_v8 = vld [vmem:[#allocation8 + $0xb10] sm:$0xff]  ;;  %v1113_v4 = vld [vmem:[#allocation8 + $0xdc8] sm:$0xff] }
 0x1be   :  { %2186 = vmatprep.subr.bf16.mxu0 %v2185_v13  ;;  %2314 = vmatprep.subr.bf16.mxu1 %v2313_v14  ;;  %v1034_v9 = vld [vmem:[#allocation8 + $0xb50] sm:$0xff]  ;;  %v1043_v13 = vld [vmem:[#allocation8 + $0xb98] sm:$0xff]  ;;  %v1161_v49 = vld [vmem:[#allocation8 + $0xf48] sm:$0xff] }
 0x1bf   :  { %v1051_v14 = vld [vmem:[#allocation8 + $0xbd8] sm:$0xff]  ;;  %v2331_v16 = vpack.c.bf16 %v1034_v9, %v1026_v8  ;;  %v2219_v8 = vpack.c.bf16 %v1096_v62, %v1088_v60  ;;  %v1162_v60 = vld [vmem:[#allocation8 + $0xf50] sm:$0xff]  ;;  %v1169_v62 = vld [vmem:[#allocation8 + $0xf88] sm:$0xff] }
 0x1c0   :  { %v2333_v20 = vpack.c.bf16 %v1051_v14, %v1043_v13  ;;  %v2221_v13 = vpack.c.bf16 %v1113_v4, %v1105_v3  ;;  %v1168_v4 = vld [vmem:[#allocation8 + $0xf80] sm:$0xff] }
 0x1c1   :  { %2188 = vmatpush1.bf16.msra.mxu0 %v2187_v21  ;;  %2316 = vmatpush1.bf16.msra.mxu1 %v2315_v23  ;;  %v1042_v21 = vld [vmem:[#allocation8 + $0xb90] sm:$0xff] }
 0x1c2   :  { %2190 = vmatprep.subr.bf16.mxu0 %v2189_v27  ;;  %2318 = vmatprep.subr.bf16.mxu1 %v2317_v28  ;;  %v1050_v23 = vld [vmem:[#allocation8 + $0xbd0] sm:$0xff]  ;;  %v1059_v27 = vld [vmem:[#allocation8 + $0xc18] sm:$0xff] }
 0x1c3   :  { %v1067_v28 = vld [vmem:[#allocation8 + $0xc58] sm:$0xff]  ;;  %v2335_v30 = vpack.c.bf16 %v1050_v23, %v1042_v21  ;;  %v2223_v21 = vpack.c.bf16 %v1112_v12, %v1104_v10  ;;  %v1170_v10 = vld [vmem:[#allocation8 + $0xf90] sm:$0xff] }
 0x1c4   :  { %v2337_v34 = vpack.c.bf16 %v1067_v28, %v1059_v27  ;;  %v2225_v27 = vpack.c.bf16 %v1129_v18, %v1121_v17  ;;  %v1178_v12 = vld [vmem:[#allocation8 + $0xfd0] sm:$0xff] }
 0x1c5   :  { %2192 = vmatpush1.bf16.msra.mxu0 %v2191_v35  ;;  %2320 = vmatpush1.bf16.msra.mxu1 %v2319_v40  ;;  %v1058_v35 = vld [vmem:[#allocation8 + $0xc10] sm:$0xff]  ;;  %v2367_v18 = vpack.c.bf16 %v1178_v12, %v1170_v10 }
 0x1c6   :  { %2194 = vmatprep.subr.bf16.mxu0 %v2193_v43  ;;  %2322 = vmatprep.subr.bf16.mxu1 %v2321_v44  ;;  %v1066_v40 = vld [vmem:[#allocation8 + $0xc50] sm:$0xff]  ;;  %v1075_v43 = vld [vmem:[#allocation8 + $0xc98] sm:$0xff] }
 0x1c7   :  { %v1083_v44 = vld [vmem:[#allocation8 + $0xcd8] sm:$0xff]  ;;  %v2339_v47 = vpack.c.bf16 %v1066_v40, %v1058_v35  ;;  %v2227_v35 = vpack.c.bf16 %v1128_v26, %v1120_v24  ;;  %v678_v24 = vld [vmem:[#allocation8 + $0x30] sm:$0xff] }
 0x1c8   :  { %v2341_v51 = vpack.c.bf16 %v1083_v44, %v1075_v43  ;;  %v2229_v43 = vpack.c.bf16 %v1145_v32, %v1137_v31  ;;  %v686_v26 = vld [vmem:[#allocation8 + $0x70] sm:$0xff] }
 0x1c9   :  { %2196 = vmatpush1.bf16.msra.mxu0 %v2195_v52  ;;  %2324 = vmatpush1.bf16.msra.mxu1 %v2323_v53  ;;  %v1074_v52 = vld [vmem:[#allocation8 + $0xc90] sm:$0xff] }
 0x1ca   :  { %2198 = vmatprep.subr.bf16.mxu0 %v2197_v55  ;;  %2326 = vmatprep.subr.bf16.mxu1 %v2325_v56  ;;  %v1082_v53 = vld [vmem:[#allocation8 + $0xcd0] sm:$0xff]  ;;  %v1091_v55 = vld [vmem:[#allocation8 + $0xd18] sm:$0xff] }
 0x1cb   :  { %v1099_v56 = vld [vmem:[#allocation8 + $0xd58] sm:$0xff]  ;;  %v2343_v59 = vpack.c.bf16 %v1082_v53, %v1074_v52  ;;  %v2231_v52 = vpack.c.bf16 %v1144_v42, %v1136_v41  ;;  %v702_v42 = vld [vmem:[#allocation8 + $0xf0] sm:$0xff] }
 0x1cc   :  { %v2345_v0 = vpack.c.bf16 %v1099_v56, %v1091_v55  ;;  %v352_v55 = vsub.s32 2, %v2902_v61  ;;  %v2233_v56 = vpack.c.bf16 %v1161_v49, %v1153_v48 }
 0x1cd   :  { %2200 = vmatpush1.bf16.msra.mxu0 %v2199_v1  ;;  %2328 = vmatpush1.bf16.msra.mxu1 %v2327_v2  ;;  %v1090_v1 = vld [vmem:[#allocation8 + $0xd10] sm:$0xff] }
 0x1ce   :  { %2202 = vmatprep.subr.bf16.mxu0 %v2201_v5  ;;  %2330 = vmatprep.subr.bf16.mxu1 %v2329_v6  ;;  %v1098_v2 = vld [vmem:[#allocation8 + $0xd50] sm:$0xff]  ;;  %v1107_v5 = vld [vmem:[#allocation8 + $0xd98] sm:$0xff] }
 0x1cf   :  { %v1115_v6 = vld [vmem:[#allocation8 + $0xdd8] sm:$0xff]  ;;  %v2347_v9 = vpack.c.bf16 %v1098_v2, %v1090_v1  ;;  %v2235_v2 = vpack.c.bf16 %v1160_v54, %v1152_v25  ;;  %v718_v54 = vld [vmem:[#allocation8 + $0x170] sm:$0xff] }
 0x1d0   :  { %v2349_v14 = vpack.c.bf16 %v1115_v6, %v1107_v5  ;;  %v1179_v1 = vld [vmem:[#allocation8 + $0xfd8] sm:$0xff]  ;;  %v1176_v5 = vld [vmem:[#allocation8 + $0xfc0] sm:$0xff]  ;;  %v353_v6 = vrot.slane %v2927_v37, %v352_v55 }
 0x1d1   :  { %2204 = vmatpush1.bf16.msra.mxu0 %v2203_v15  ;;  %2332 = vmatpush1.bf16.msra.mxu1 %v2331_v16  ;;  %v1106_v15 = vld [vmem:[#allocation8 + $0xd90] sm:$0xff]  ;;  %v2239_v17 = vpack.c.bf16 %v1176_v5, %v1168_v4  ;;  %v741_v5 = vld [vmem:[#allocation8 + $0x228] sm:$0xff] }
 0x1d2   :  { %2206 = vmatprep.subr.bf16.mxu0 %v2205_v19  ;;  %2334 = vmatprep.subr.bf16.mxu1 %v2333_v20  ;;  %v1114_v16 = vld [vmem:[#allocation8 + $0xdd0] sm:$0xff]  ;;  %v1123_v19 = vld [vmem:[#allocation8 + $0xe18] sm:$0xff] }
 0x1d3   :  { %v1131_v20 = vld [vmem:[#allocation8 + $0xe58] sm:$0xff]  ;;  %v2351_v23 = vpack.c.bf16 %v1114_v16, %v1106_v15  ;;  %v734_v4 = vld [vmem:[#allocation8 + $0x1f0] sm:$0xff] }
 0x1d4   :  { %v2353_v28 = vpack.c.bf16 %v1131_v20, %v1123_v19  ;;  %v679_v15 = vld [vmem:[#allocation8 + $0x38] sm:$0xff]  ;;  %v2627_v19 = vadd.f32 %v2940_v46, %v353_v6  ;;  %v2499_v46 = vpack.c.bf16 %v686_v26, %v678_v24  ;;  %v749_v6 = vld [vmem:[#allocation8 + $0x268] sm:$0xff] }
 0x1d5   :  { %2208 = vmatpush1.bf16.msra.mxu0 %v2207_v29  ;;  %2336 = vmatpush1.bf16.msra.mxu1 %v2335_v30  ;;  %v1122_v29 = vld [vmem:[#allocation8 + $0xe10] sm:$0xff]  ;;  %v687_v16 = vld [vmem:[#allocation8 + $0x78] sm:$0xff] }
 0x1d6   :  { %2210 = vmatprep.subr.bf16.mxu0 %v2209_v33  ;;  %2338 = vmatprep.subr.bf16.mxu1 %v2337_v34  ;;  %v1130_v30 = vld [vmem:[#allocation8 + $0xe50] sm:$0xff]  ;;  %v1139_v33 = vld [vmem:[#allocation8 + $0xe98] sm:$0xff]  ;;  %v2497_v37 = vpack.c.bf16 %v687_v16, %v679_v15  ;;  %v2959_v32 = vmax.f32 %v2627_v19, 0.0  ;;  %v748_v15 = vld [vmem:[#allocation8 + $0x260] sm:$0xff] }
 0x1d7   :  { %v1147_v34 = vld [vmem:[#allocation8 + $0xed8] sm:$0xff]  ;;  %v2355_v40 = vpack.c.bf16 %v1130_v30, %v1122_v29  ;;  %v742_v16 = vld [vmem:[#allocation8 + $0x230] sm:$0xff]  ;;  %v757_v19 = vld [vmem:[#allocation8 + $0x2a8] sm:$0xff] }
 0x1d8   :  { %v2357_v44 = vpack.c.bf16 %v1147_v34, %v1139_v33  ;;  %v695_v29 = vld [vmem:[#allocation8 + $0xb8] sm:$0xff]  ;;  %v692_v33 = vld [vmem:[#allocation8 + $0xa0] sm:$0xff] }
 0x1d9   :  { %2212 = vmatpush1.bf16.msra.mxu0 %v2211_v45  ;;  %2340 = vmatpush1.bf16.msra.mxu1 %v2339_v47  ;;  %v1138_v45 = vld [vmem:[#allocation8 + $0xe90] sm:$0xff]  ;;  %v703_v30 = vld [vmem:[#allocation8 + $0xf8] sm:$0xff]  ;;  %v700_v34 = vld [vmem:[#allocation8 + $0xe0] sm:$0xff] }
 0x1da   :  { %2214 = vmatprep.subr.bf16.mxu0 %v2213_v50  ;;  %2342 = vmatprep.subr.bf16.mxu1 %v2341_v51  ;;  %v1146_v47 = vld [vmem:[#allocation8 + $0xed0] sm:$0xff]  ;;  %v1155_v50 = vld [vmem:[#allocation8 + $0xf18] sm:$0xff]  ;;  %v2501_v41 = vpack.c.bf16 %v703_v30, %v695_v29  ;;  %v2375_v48 = vpack.c.bf16 %v700_v34, %v692_v33  ;;  %v781_v33 = vld [vmem:[#allocation8 + $0x368] sm:$0xff] }
 0x1db   :  { %v1163_v51 = vld [vmem:[#allocation8 + $0xf58] sm:$0xff]  ;;  %v2359_v53 = vpack.c.bf16 %v1146_v47, %v1138_v45  ;;  %v758_v29 = vld [vmem:[#allocation8 + $0x2b0] sm:$0xff] }
 0x1dc   :  { %v711_v45 = vld [vmem:[#allocation8 + $0x138] sm:$0xff] }
 0x1dd   :  { %2216 = vmatpush1.bf16.msra.mxu0 %v2215_v58  ;;  %2344 = vmatpush1.bf16.msra.mxu1 %v2343_v59  ;;  %v2361_v58 = vpack.c.bf16 %v1163_v51, %v1155_v50  ;;  %v1154_v59 = vld [vmem:[#allocation8 + $0xf10] sm:$0xff]  ;;  %v719_v47 = vld [vmem:[#allocation8 + $0x178] sm:$0xff]  ;;  %v708_v51 = vld [vmem:[#allocation8 + $0x120] sm:$0xff] }
 0x1de   :  { %2218 = vmatprep.subr.bf16.mxu0 %v2217_v63  ;;  %2346 = vmatprep.subr.bf16.mxu1 %v2345_v0  ;;  %v1177_v63 = vld [vmem:[#allocation8 + $0xfc8] sm:$0xff]  ;;  %v1171_v0 = vld [vmem:[#allocation8 + $0xf98] sm:$0xff]  ;;  %v2363_v3 = vpack.c.bf16 %v1162_v60, %v1154_v59  ;;  %v2505_v25 = vpack.c.bf16 %v719_v47, %v711_v45  ;;  %v774_v45 = vld [vmem:[#allocation8 + $0x330] sm:$0xff] }
 0x1df   :  { %v727_v59 = vld [vmem:[#allocation8 + $0x1b8] sm:$0xff] }
 0x1e0   :  { %v735_v60 = vld [vmem:[#allocation8 + $0x1f8] sm:$0xff] }
 0x1e1   :  { %2220 = vmatpush1.bf16.msra.mxu0 %v2219_v8  ;;  %2348 = vmatpush1.bf16.msra.mxu1 %v2347_v9  ;;  %v2237_v8 = vpack.c.bf16 %v1177_v63, %v1169_v62  ;;  %v2365_v9 = vpack.c.bf16 %v1179_v1, %v1171_v0  ;;  %v732_v1 = vld [vmem:[#allocation8 + $0x1e0] sm:$0xff]  ;;  %v775_v34 = vld [vmem:[#allocation8 + $0x338] sm:$0xff] }
 0x1e2   :  { %2222 = vmatprep.subr.bf16.mxu0 %v2221_v13  ;;  %2350 = vmatprep.subr.bf16.mxu1 %v2349_v14  ;;  %v677_v13 = vld [vmem:[#allocation8 + $0x28] sm:$0xff] }
 0x1e3   :  { %v685_v14 = vld [vmem:[#allocation8 + $0x68] sm:$0xff] }
 0x1e4   :  { %v2369_v20 = vpack.c.bf16 %v685_v14, %v677_v13  ;;  %v2385_v13 = vpack.c.bf16 %v749_v6, %v741_v5  ;;  %v740_v14 = vld [vmem:[#allocation8 + $0x220] sm:$0xff] }
 0x1e5   :  { %2224 = vmatpush1.bf16.msra.mxu0 %v2223_v21  ;;  %2352 = vmatpush1.bf16.msra.mxu1 %v2351_v23  ;;  %v676_v21 = vld [vmem:[#allocation8 + $0x20] sm:$0xff] }
 0x1e6   :  { %2226 = vmatprep.subr.bf16.mxu0 %v2225_v27  ;;  %2354 = vmatprep.subr.bf16.mxu1 %v2353_v28  ;;  %v684_v23 = vld [vmem:[#allocation8 + $0x60] sm:$0xff]  ;;  %v693_v27 = vld [vmem:[#allocation8 + $0xa8] sm:$0xff] }
 0x1e7   :  { %v701_v28 = vld [vmem:[#allocation8 + $0xe8] sm:$0xff]  ;;  %v2371_v31 = vpack.c.bf16 %v684_v23, %v676_v21  ;;  %v767_v21 = vld [vmem:[#allocation8 + $0x2f8] sm:$0xff]  ;;  %v2387_v23 = vpack.c.bf16 %v748_v15, %v740_v14  ;;  %v804_v5 = vld [vmem:[#allocation8 + $0x420] sm:$0xff] }
 0x1e8   :  { %v812_v6 = vld [vmem:[#allocation8 + $0x460] sm:$0xff]  ;;  %v823_v14 = vld [vmem:[#allocation8 + $0x4b8] sm:$0xff] }
 0x1e9   :  { %2228 = vmatpush1.bf16.msra.mxu0 %v2227_v35  ;;  %2356 = vmatpush1.bf16.msra.mxu1 %v2355_v40  ;;  %v694_v35 = vld [vmem:[#allocation8 + $0xb0] sm:$0xff]  ;;  %v2373_v40 = vpack.c.bf16 %v701_v28, %v693_v27  ;;  %v756_v27 = vld [vmem:[#allocation8 + $0x2a0] sm:$0xff]  ;;  %v831_v15 = vld [vmem:[#allocation8 + $0x4f8] sm:$0xff] }
 0x1ea   :  { %2230 = vmatprep.subr.bf16.mxu0 %v2229_v43  ;;  %2358 = vmatprep.subr.bf16.mxu1 %v2357_v44  ;;  %v709_v43 = vld [vmem:[#allocation8 + $0x128] sm:$0xff]  ;;  %v2503_v49 = vpack.c.bf16 %v702_v42, %v694_v35  ;;  %v764_v28 = vld [vmem:[#allocation8 + $0x2e0] sm:$0xff]  ;;  %v783_v35 = vld [vmem:[#allocation8 + $0x378] sm:$0xff] }
 0x1eb   :  { %v717_v44 = vld [vmem:[#allocation8 + $0x168] sm:$0xff]  ;;  %v2521_v47 = vpack.c.bf16 %v783_v35, %v775_v34  ;;  %v838_v34 = vld [vmem:[#allocation8 + $0x530] sm:$0xff] }
 0x1ec   :  { %v2377_v50 = vpack.c.bf16 %v717_v44, %v709_v43  ;;  %v772_v43 = vld [vmem:[#allocation8 + $0x320] sm:$0xff] }
 0x1ed   :  { %2232 = vmatpush1.bf16.msra.mxu0 %v2231_v52  ;;  %2360 = vmatpush1.bf16.msra.mxu1 %v2359_v53  ;;  %v716_v52 = vld [vmem:[#allocation8 + $0x160] sm:$0xff]  ;;  %v710_v53 = vld [vmem:[#allocation8 + $0x130] sm:$0xff] }
 0x1ee   :  { %2234 = vmatprep.subr.bf16.mxu0 %v2233_v56  ;;  %2362 = vmatprep.subr.bf16.mxu1 %v2361_v58  ;;  %v725_v56 = vld [vmem:[#allocation8 + $0x1a8] sm:$0xff]  ;;  %v2379_v62 = vpack.c.bf16 %v716_v52, %v708_v51  ;;  %v2507_v63 = vpack.c.bf16 %v718_v54, %v710_v53  ;;  %v780_v44 = vld [vmem:[#allocation8 + $0x360] sm:$0xff]  ;;  %v791_v51 = vld [vmem:[#allocation8 + $0x3b8] sm:$0xff] }
 0x1ef   :  { %v733_v58 = vld [vmem:[#allocation8 + $0x1e8] sm:$0xff]  ;;  %v799_v52 = vld [vmem:[#allocation8 + $0x3f8] sm:$0xff]  ;;  %v2395_v53 = vpack.c.bf16 %v780_v44, %v772_v43 }
 0x1f0   :  { %v2381_v0 = vpack.c.bf16 %v733_v58, %v725_v56  ;;  %v788_v56 = vld [vmem:[#allocation8 + $0x3a0] sm:$0xff]  ;;  %v855_v43 = vld [vmem:[#allocation8 + $0x5b8] sm:$0xff] }
 0x1f1   :  { %2236 = vmatpush1.bf16.msra.mxu0 %v2235_v2  ;;  %2364 = vmatpush1.bf16.msra.mxu1 %v2363_v3  ;;  %v726_v2 = vld [vmem:[#allocation8 + $0x1b0] sm:$0xff]  ;;  %v2509_v3 = vpack.c.bf16 %v735_v60, %v727_v59  ;;  %v796_v58 = vld [vmem:[#allocation8 + $0x3e0] sm:$0xff]  ;;  %v2525_v60 = vpack.c.bf16 %v799_v52, %v791_v51  ;;  %v863_v44 = vld [vmem:[#allocation8 + $0x5f8] sm:$0xff] }
 0x1f2   :  { %2238 = vmatprep.subr.bf16.mxu0 %v2237_v8  ;;  %2366 = vmatprep.subr.bf16.mxu1 %v2365_v9  ;;  %v743_v8 = vld [vmem:[#allocation8 + $0x238] sm:$0xff]  ;;  %v2511_v12 = vpack.c.bf16 %v734_v4, %v726_v2  ;;  %v790_v59 = vld [vmem:[#allocation8 + $0x3b0] sm:$0xff]  ;;  %v2399_v2 = vpack.c.bf16 %v796_v58, %v788_v56  ;;  %v2541_v52 = vpack.c.bf16 %v863_v44, %v855_v43 }
 0x1f3   :  { %v751_v9 = vld [vmem:[#allocation8 + $0x278] sm:$0xff]  ;;  %v854_v51 = vld [vmem:[#allocation8 + $0x5b0] sm:$0xff] }
 0x1f4   :  { %v871_v56 = vld [vmem:[#allocation8 + $0x638] sm:$0xff]  ;;  %v918_v43 = vld [vmem:[#allocation8 + $0x7b0] sm:$0xff] }
 0x1f5   :  { %2240 = vmatpush1.bf16.msra.mxu0 %v2239_v17  ;;  %2368 = vmatpush1.bf16.msra.mxu1 %v2367_v18  ;;  %v2513_v17 = vpack.c.bf16 %v751_v9, %v743_v8  ;;  %v750_v18 = vld [vmem:[#allocation8 + $0x270] sm:$0xff]  ;;  %v879_v58 = vld [vmem:[#allocation8 + $0x678] sm:$0xff] }
 0x1f6   :  { %2370 = vmatprep.subr.bf16.mxu0 %v2369_v20  ;;  %2498 = vmatprep.subr.bf16.mxu1 %v2497_v37  ;;  %v765_v20 = vld [vmem:[#allocation8 + $0x2e8] sm:$0xff]  ;;  %v759_v37 = vld [vmem:[#allocation8 + $0x2b8] sm:$0xff]  ;;  %v2515_v24 = vpack.c.bf16 %v750_v18, %v742_v16  ;;  %v806_v8 = vld [vmem:[#allocation8 + $0x430] sm:$0xff]  ;;  %v2403_v16 = vpack.c.bf16 %v812_v6, %v804_v5 }
 0x1f7   :  { %v2389_v26 = vpack.c.bf16 %v765_v20, %v757_v19  ;;  %v2517_v30 = vpack.c.bf16 %v767_v21, %v759_v37  ;;  %v820_v19 = vld [vmem:[#allocation8 + $0x4a0] sm:$0xff]  ;;  %v822_v37 = vld [vmem:[#allocation8 + $0x4b0] sm:$0xff]  ;;  %v2533_v21 = vpack.c.bf16 %v831_v15, %v823_v14  ;;  %v887_v5 = vld [vmem:[#allocation8 + $0x6b8] sm:$0xff] }
 0x1f8   :  { %1362 = vmatmul.mubr.f32.vlgmr.msra.gmra.mrb[2].mxu0 %v2959_v32  ;;  %1504 = vmatmul.mubr.f32.vlgmr.msra.gmra.mrb[2].mxu1 %v2959_v32  ;;  %v828_v20 = vld [vmem:[#allocation8 + $0x4e0] sm:$0xff]  ;;  %v895_v6 = vld [vmem:[#allocation8 + $0x6f8] sm:$0xff]  ;;  %v886_v14 = vld [vmem:[#allocation8 + $0x6b0] sm:$0xff] }
 0x1f9   :  { %2372 = vmatpush1.bf16.msra.mxu0 %v2371_v31  ;;  %1574 = vmatprep.mubr.f32.mxu0 %v2942_v57  ;;  %v766_v31 = vld [vmem:[#allocation8 + $0x2f0] sm:$0xff]  ;;  %v2549_v15 = vpack.c.bf16 %v895_v6, %v887_v5 }
 0x1fa   :  { %2500 = vmatpush1.bf16.msra.mxu1 %v2499_v46  ;;  %1716 = vmatprep.mubr.f32.mxu1 %v2942_v57  ;;  %v724_v57 = vld [vmem:[#allocation8 + $0x1a0] sm:$0xff]  ;;  %v773_v46 = vld [vmem:[#allocation8 + $0x328] sm:$0xff]  ;;  %v958_v6 = vld [vmem:[#allocation8 + $0x8f0] sm:$0xff] }
 0x1fb   :  { %2374 = vmatprep.subr.bf16.mxu0 %v2373_v40  ;;  %2502 = vmatprep.subr.bf16.mxu1 %v2501_v41  ;;  %v2383_v10 = vpack.c.bf16 %v732_v1, %v724_v57  ;;  %v2391_v40 = vpack.c.bf16 %v764_v28, %v756_v27  ;;  %v2519_v41 = vpack.c.bf16 %v766_v31, %v758_v29  ;;  %v807_v57 = vld [vmem:[#allocation8 + $0x438] sm:$0xff] }
 0x1fc   :  { %v2393_v42 = vpack.c.bf16 %v781_v33, %v773_v46  ;;  %v815_v1 = vld [vmem:[#allocation8 + $0x478] sm:$0xff]  ;;  %v2407_v29 = vpack.c.bf16 %v828_v20, %v820_v19  ;;  %v836_v46 = vld [vmem:[#allocation8 + $0x520] sm:$0xff] }
 0x1fd   :  { %2376 = vmatpush1.bf16.msra.mxu0 %v2375_v48  ;;  %v782_v48 = vld [vmem:[#allocation8 + $0x370] sm:$0xff]  ;;  %v2529_v9 = vpack.c.bf16 %v815_v1, %v807_v57  ;;  %v839_v27 = vld [vmem:[#allocation8 + $0x538] sm:$0xff]  ;;  %v844_v33 = vld [vmem:[#allocation8 + $0x560] sm:$0xff]  ;;  %v2545_v1 = vpack.c.bf16 %v879_v58, %v871_v56 }
 0x1fe   :  { %2504 = vmatpush1.bf16.msra.mxu1 %v2503_v49  ;;  %2378 = vmatprep.subr.bf16.mxu0 %v2377_v50  ;;  %v789_v49 = vld [vmem:[#allocation8 + $0x3a8] sm:$0xff]  ;;  %v847_v28 = vld [vmem:[#allocation8 + $0x578] sm:$0xff]  ;;  %v870_v57 = vld [vmem:[#allocation8 + $0x630] sm:$0xff] }
 0x1ff   :  { %2506 = vmatprep.subr.bf16.mxu1 %v2505_v25  ;;  %v797_v50 = vld [vmem:[#allocation8 + $0x3e8] sm:$0xff]  ;;  %v2523_v25 = vpack.c.bf16 %v782_v48, %v774_v45  ;;  %v2537_v35 = vpack.c.bf16 %v847_v28, %v839_v27  ;;  %v2411_v45 = vpack.c.bf16 %v844_v33, %v836_v46  ;;  %v903_v19 = vld [vmem:[#allocation8 + $0x738] sm:$0xff]  ;;  %v902_v27 = vld [vmem:[#allocation8 + $0x730] sm:$0xff] }
 0x200   :  { %v2397_v54 = vpack.c.bf16 %v797_v50, %v789_v49  ;;  %v852_v49 = vld [vmem:[#allocation8 + $0x5a0] sm:$0xff]  ;;  %v911_v20 = vld [vmem:[#allocation8 + $0x778] sm:$0xff]  ;;  %v934_v58 = vld [vmem:[#allocation8 + $0x830] sm:$0xff] }
 0x201   :  { %2380 = vmatpush1.bf16.msra.mxu0 %v2379_v62  ;;  %v798_v62 = vld [vmem:[#allocation8 + $0x3f0] sm:$0xff]  ;;  %v860_v50 = vld [vmem:[#allocation8 + $0x5e0] sm:$0xff]  ;;  %v2553_v28 = vpack.c.bf16 %v911_v20, %v903_v19  ;;  %v919_v46 = vld [vmem:[#allocation8 + $0x7b8] sm:$0xff] }
 0x202   :  { %2508 = vmatpush1.bf16.msra.mxu1 %v2507_v63  ;;  %2382 = vmatprep.subr.bf16.mxu0 %v2381_v0  ;;  %v805_v63 = vld [vmem:[#allocation8 + $0x428] sm:$0xff]  ;;  %v927_v33 = vld [vmem:[#allocation8 + $0x7f8] sm:$0xff]  ;;  %v966_v19 = vld [vmem:[#allocation8 + $0x930] sm:$0xff] }
 0x203   :  { %2510 = vmatprep.subr.bf16.mxu1 %v2509_v3  ;;  %v813_v0 = vld [vmem:[#allocation8 + $0x468] sm:$0xff]  ;;  %v2527_v3 = vpack.c.bf16 %v798_v62, %v790_v59  ;;  %v2415_v59 = vpack.c.bf16 %v860_v50, %v852_v49  ;;  %v2557_v44 = vpack.c.bf16 %v927_v33, %v919_v46  ;;  %v935_v49 = vld [vmem:[#allocation8 + $0x838] sm:$0xff] }
 0x204   :  { %v2401_v4 = vpack.c.bf16 %v813_v0, %v805_v63  ;;  %v868_v63 = vld [vmem:[#allocation8 + $0x620] sm:$0xff]  ;;  %v943_v50 = vld [vmem:[#allocation8 + $0x878] sm:$0xff]  ;;  %v997_v33 = vld [vmem:[#allocation8 + $0xa28] sm:$0xff] }
 0x205   :  { %2384 = vmatpush1.bf16.msra.mxu0 %v2383_v10  ;;  %v814_v10 = vld [vmem:[#allocation8 + $0x470] sm:$0xff]  ;;  %v876_v0 = vld [vmem:[#allocation8 + $0x660] sm:$0xff]  ;;  %v2561_v56 = vpack.c.bf16 %v943_v50, %v935_v49  ;;  %v1013_v50 = vld [vmem:[#allocation8 + $0xaa8] sm:$0xff] }
 0x206   :  { %2512 = vmatpush1.bf16.msra.mxu1 %v2511_v12  ;;  %2386 = vmatprep.subr.bf16.mxu0 %v2385_v13  ;;  %v821_v12 = vld [vmem:[#allocation8 + $0x4a8] sm:$0xff]  ;;  %v1006_v49 = vld [vmem:[#allocation8 + $0xa70] sm:$0xff] }
 0x207   :  { %2514 = vmatprep.subr.bf16.mxu1 %v2513_v17  ;;  %v829_v13 = vld [vmem:[#allocation8 + $0x4e8] sm:$0xff]  ;;  %v2531_v17 = vpack.c.bf16 %v814_v10, %v806_v8  ;;  %v2419_v8 = vpack.c.bf16 %v876_v0, %v868_v63  ;;  %v951_v0 = vld [vmem:[#allocation8 + $0x8b8] sm:$0xff] }
 0x208   :  { %v2405_v18 = vpack.c.bf16 %v829_v13, %v821_v12  ;;  %v884_v12 = vld [vmem:[#allocation8 + $0x6a0] sm:$0xff] }
 0x209   :  { %2388 = vmatpush1.bf16.msra.mxu0 %v2387_v23  ;;  %v830_v23 = vld [vmem:[#allocation8 + $0x4f0] sm:$0xff]  ;;  %v892_v13 = vld [vmem:[#allocation8 + $0x6e0] sm:$0xff] }
 0x20a   :  { %2516 = vmatpush1.bf16.msra.mxu1 %v2515_v24  ;;  %2390 = vmatprep.subr.bf16.mxu0 %v2389_v26  ;;  %v837_v24 = vld [vmem:[#allocation8 + $0x528] sm:$0xff] }
 0x20b   :  { %2518 = vmatprep.subr.bf16.mxu1 %v2517_v30  ;;  %v845_v26 = vld [vmem:[#allocation8 + $0x568] sm:$0xff]  ;;  %v2535_v30 = vpack.c.bf16 %v830_v23, %v822_v37  ;;  %v2423_v37 = vpack.c.bf16 %v892_v13, %v884_v12  ;;  %v967_v12 = vld [vmem:[#allocation8 + $0x938] sm:$0xff] }
 0x20c   :  { %v2409_v31 = vpack.c.bf16 %v845_v26, %v837_v24  ;;  %v900_v24 = vld [vmem:[#allocation8 + $0x720] sm:$0xff]  ;;  %v975_v13 = vld [vmem:[#allocation8 + $0x978] sm:$0xff] }
 0x20d   :  { %2392 = vmatpush1.bf16.msra.mxu0 %v2391_v40  ;;  %v846_v40 = vld [vmem:[#allocation8 + $0x570] sm:$0xff]  ;;  %v908_v26 = vld [vmem:[#allocation8 + $0x760] sm:$0xff]  ;;  %v2569_v20 = vpack.c.bf16 %v975_v13, %v967_v12  ;;  %v1045_v13 = vld [vmem:[#allocation8 + $0xba8] sm:$0xff] }
 0x20e   :  { %2520 = vmatpush1.bf16.msra.mxu1 %v2519_v41  ;;  %2394 = vmatprep.subr.bf16.mxu0 %v2393_v42  ;;  %v853_v41 = vld [vmem:[#allocation8 + $0x5a8] sm:$0xff]  ;;  %v1038_v12 = vld [vmem:[#allocation8 + $0xb70] sm:$0xff] }
 0x20f   :  { %2522 = vmatprep.subr.bf16.mxu1 %v2521_v47  ;;  %v861_v42 = vld [vmem:[#allocation8 + $0x5e8] sm:$0xff]  ;;  %v2539_v47 = vpack.c.bf16 %v846_v40, %v838_v34  ;;  %v2427_v34 = vpack.c.bf16 %v908_v26, %v900_v24  ;;  %v983_v24 = vld [vmem:[#allocation8 + $0x9b8] sm:$0xff] }
 0x210   :  { %v2413_v48 = vpack.c.bf16 %v861_v42, %v853_v41  ;;  %v916_v41 = vld [vmem:[#allocation8 + $0x7a0] sm:$0xff] }
 0x211   :  { %2396 = vmatpush1.bf16.msra.mxu0 %v2395_v53  ;;  %v862_v53 = vld [vmem:[#allocation8 + $0x5f0] sm:$0xff]  ;;  %v924_v42 = vld [vmem:[#allocation8 + $0x7e0] sm:$0xff] }
 0x212   :  { %2524 = vmatpush1.bf16.msra.mxu1 %v2523_v25  ;;  %2398 = vmatprep.subr.bf16.mxu0 %v2397_v54  ;;  %v869_v25 = vld [vmem:[#allocation8 + $0x628] sm:$0xff] }
 0x213   :  { %2526 = vmatprep.subr.bf16.mxu1 %v2525_v60  ;;  %v877_v54 = vld [vmem:[#allocation8 + $0x668] sm:$0xff]  ;;  %v2543_v60 = vpack.c.bf16 %v862_v53, %v854_v51  ;;  %v2431_v51 = vpack.c.bf16 %v924_v42, %v916_v41 }
 0x214   :  { %v2417_v62 = vpack.c.bf16 %v877_v54, %v869_v25  ;;  %v932_v25 = vld [vmem:[#allocation8 + $0x820] sm:$0xff] }
 0x215   :  { %2400 = vmatpush1.bf16.msra.mxu0 %v2399_v2  ;;  %v878_v2 = vld [vmem:[#allocation8 + $0x670] sm:$0xff]  ;;  %v940_v54 = vld [vmem:[#allocation8 + $0x860] sm:$0xff] }
 0x216   :  { %2528 = vmatpush1.bf16.msra.mxu1 %v2527_v3  ;;  %2402 = vmatprep.subr.bf16.mxu0 %v2401_v4  ;;  %v885_v3 = vld [vmem:[#allocation8 + $0x6a8] sm:$0xff]  ;;  %v2435_v63 = vpack.c.bf16 %v940_v54, %v932_v25 }
 0x217   :  { %2530 = vmatprep.subr.bf16.mxu1 %v2529_v9  ;;  %v893_v4 = vld [vmem:[#allocation8 + $0x6e8] sm:$0xff]  ;;  %v2547_v9 = vpack.c.bf16 %v878_v2, %v870_v57  ;;  %v959_v57 = vld [vmem:[#allocation8 + $0x8f8] sm:$0xff]  ;;  %v948_v2 = vld [vmem:[#allocation8 + $0x8a0] sm:$0xff] }
 0x218   :  { %v2421_v10 = vpack.c.bf16 %v893_v4, %v885_v3  ;;  %v956_v3 = vld [vmem:[#allocation8 + $0x8e0] sm:$0xff]  ;;  %v950_v4 = vld [vmem:[#allocation8 + $0x8b0] sm:$0xff] }
 0x219   :  { %2404 = vmatpush1.bf16.msra.mxu0 %v2403_v16  ;;  %v894_v16 = vld [vmem:[#allocation8 + $0x6f0] sm:$0xff] }
 0x21a   :  { %2532 = vmatpush1.bf16.msra.mxu1 %v2531_v17  ;;  %2406 = vmatprep.subr.bf16.mxu0 %v2405_v18  ;;  %v901_v17 = vld [vmem:[#allocation8 + $0x728] sm:$0xff] }
 0x21b   :  { %2534 = vmatprep.subr.bf16.mxu1 %v2533_v21  ;;  %v909_v18 = vld [vmem:[#allocation8 + $0x768] sm:$0xff]  ;;  %v2551_v21 = vpack.c.bf16 %v894_v16, %v886_v14  ;;  %v2439_v14 = vpack.c.bf16 %v956_v3, %v948_v2  ;;  %v1039_v2 = vld [vmem:[#allocation8 + $0xb78] sm:$0xff] }
 0x21c   :  { %v2425_v23 = vpack.c.bf16 %v909_v18, %v901_v17  ;;  %v964_v17 = vld [vmem:[#allocation8 + $0x920] sm:$0xff] }
 0x21d   :  { %2408 = vmatpush1.bf16.msra.mxu0 %v2407_v29  ;;  %v910_v29 = vld [vmem:[#allocation8 + $0x770] sm:$0xff]  ;;  %v972_v18 = vld [vmem:[#allocation8 + $0x960] sm:$0xff] }
 0x21e   :  { %2536 = vmatpush1.bf16.msra.mxu1 %v2535_v30  ;;  %2410 = vmatprep.subr.bf16.mxu0 %v2409_v31  ;;  %v917_v30 = vld [vmem:[#allocation8 + $0x7a8] sm:$0xff]  ;;  %v2443_v26 = vpack.c.bf16 %v972_v18, %v964_v17 }
 0x21f   :  { %2538 = vmatprep.subr.bf16.mxu1 %v2537_v35  ;;  %v925_v31 = vld [vmem:[#allocation8 + $0x7e8] sm:$0xff]  ;;  %v2555_v35 = vpack.c.bf16 %v910_v29, %v902_v27  ;;  %v980_v29 = vld [vmem:[#allocation8 + $0x9a0] sm:$0xff] }
 0x220   :  { %v2429_v40 = vpack.c.bf16 %v925_v31, %v917_v30  ;;  %v988_v30 = vld [vmem:[#allocation8 + $0x9e0] sm:$0xff]  ;;  %v982_v31 = vld [vmem:[#allocation8 + $0x9b0] sm:$0xff] }
 0x221   :  { %2412 = vmatpush1.bf16.msra.mxu0 %v2411_v45  ;;  %v926_v45 = vld [vmem:[#allocation8 + $0x7f0] sm:$0xff]  ;;  %v2447_v41 = vpack.c.bf16 %v988_v30, %v980_v29 }
 0x222   :  { %2540 = vmatpush1.bf16.msra.mxu1 %v2539_v47  ;;  %2414 = vmatprep.subr.bf16.mxu0 %v2413_v48  ;;  %v933_v47 = vld [vmem:[#allocation8 + $0x828] sm:$0xff] }
 0x223   :  { %2542 = vmatprep.subr.bf16.mxu1 %v2541_v52  ;;  %v941_v48 = vld [vmem:[#allocation8 + $0x868] sm:$0xff]  ;;  %v2559_v52 = vpack.c.bf16 %v926_v45, %v918_v43  ;;  %v1004_v45 = vld [vmem:[#allocation8 + $0xa60] sm:$0xff] }
 0x224   :  { %v2433_v53 = vpack.c.bf16 %v941_v48, %v933_v47  ;;  %v998_v47 = vld [vmem:[#allocation8 + $0xa30] sm:$0xff] }
 0x225   :  { %2416 = vmatpush1.bf16.msra.mxu0 %v2415_v59  ;;  %v942_v59 = vld [vmem:[#allocation8 + $0x870] sm:$0xff]  ;;  %v2579_v54 = vpack.c.bf16 %v1006_v49, %v998_v47  ;;  %v1084_v49 = vld [vmem:[#allocation8 + $0xce0] sm:$0xff] }
 0x226   :  { %2544 = vmatpush1.bf16.msra.mxu1 %v2543_v60  ;;  %2418 = vmatprep.subr.bf16.mxu0 %v2417_v62  ;;  %v949_v60 = vld [vmem:[#allocation8 + $0x8a8] sm:$0xff] }
 0x227   :  { %2546 = vmatprep.subr.bf16.mxu1 %v2545_v1  ;;  %v957_v62 = vld [vmem:[#allocation8 + $0x8e8] sm:$0xff]  ;;  %v2563_v1 = vpack.c.bf16 %v942_v59, %v934_v58  ;;  %v1012_v58 = vld [vmem:[#allocation8 + $0xaa0] sm:$0xff] }
 0x228   :  { %v2437_v5 = vpack.c.bf16 %v957_v62, %v949_v60  ;;  %v1020_v59 = vld [vmem:[#allocation8 + $0xae0] sm:$0xff]  ;;  %v1014_v60 = vld [vmem:[#allocation8 + $0xab0] sm:$0xff] }
 0x229   :  { %2420 = vmatpush1.bf16.msra.mxu0 %v2419_v8  ;;  %v965_v8 = vld [vmem:[#allocation8 + $0x928] sm:$0xff]  ;;  %v2455_v3 = vpack.c.bf16 %v1020_v59, %v1012_v58 }
 0x22a   :  { %2548 = vmatpush1.bf16.msra.mxu1 %v2547_v9  ;;  %2422 = vmatprep.subr.bf16.mxu0 %v2421_v10  ;;  %v973_v9 = vld [vmem:[#allocation8 + $0x968] sm:$0xff]  ;;  %v2565_v10 = vpack.c.bf16 %v959_v57, %v951_v0 }
 0x22b   :  { %2550 = vmatprep.subr.bf16.mxu1 %v2549_v15  ;;  %v2567_v15 = vpack.c.bf16 %v958_v6, %v950_v4  ;;  %v2441_v16 = vpack.c.bf16 %v973_v9, %v965_v8  ;;  %v1029_v0 = vld [vmem:[#allocation8 + $0xb28] sm:$0xff]  ;;  %v1028_v6 = vld [vmem:[#allocation8 + $0xb20] sm:$0xff]  ;;  %v1030_v9 = vld [vmem:[#allocation8 + $0xb30] sm:$0xff] }
 0x22c   :  { %v1037_v57 = vld [vmem:[#allocation8 + $0xb68] sm:$0xff]  ;;  %v1036_v8 = vld [vmem:[#allocation8 + $0xb60] sm:$0xff]  ;;  %v2587_v18 = vpack.c.bf16 %v1038_v12, %v1030_v9 }
 0x22d   :  { %2424 = vmatpush1.bf16.msra.mxu0 %v2423_v37  ;;  %v974_v37 = vld [vmem:[#allocation8 + $0x970] sm:$0xff]  ;;  %v2459_v17 = vpack.c.bf16 %v1036_v8, %v1028_v6  ;;  %v1116_v12 = vld [vmem:[#allocation8 + $0xde0] sm:$0xff] }
 0x22e   :  { %2552 = vmatpush1.bf16.msra.mxu1 %v2551_v21  ;;  %2426 = vmatprep.subr.bf16.mxu0 %v2425_v23  ;;  %v981_v21 = vld [vmem:[#allocation8 + $0x9a8] sm:$0xff]  ;;  %v2571_v27 = vpack.c.bf16 %v974_v37, %v966_v19  ;;  %v1052_v37 = vld [vmem:[#allocation8 + $0xbe0] sm:$0xff] }
 0x22f   :  { %2554 = vmatprep.subr.bf16.mxu1 %v2553_v28  ;;  %v989_v23 = vld [vmem:[#allocation8 + $0x9e8] sm:$0xff] }
 0x230   :  { %v2445_v28 = vpack.c.bf16 %v989_v23, %v981_v21  ;;  %v1046_v21 = vld [vmem:[#allocation8 + $0xbb0] sm:$0xff] }
 0x231   :  { %2428 = vmatpush1.bf16.msra.mxu0 %v2427_v34  ;;  %v1005_v34 = vld [vmem:[#allocation8 + $0xa68] sm:$0xff] }
 0x232   :  { %2556 = vmatpush1.bf16.msra.mxu1 %v2555_v35  ;;  %2430 = vmatprep.subr.bf16.mxu0 %v2429_v40  ;;  %v999_v35 = vld [vmem:[#allocation8 + $0xa38] sm:$0xff]  ;;  %v2449_v43 = vpack.c.bf16 %v1005_v34, %v997_v33  ;;  %v1062_v33 = vld [vmem:[#allocation8 + $0xc30] sm:$0xff] }
 0x233   :  { %2558 = vmatprep.subr.bf16.mxu1 %v2557_v44  ;;  %v1007_v40 = vld [vmem:[#allocation8 + $0xa78] sm:$0xff]  ;;  %v996_v44 = vld [vmem:[#allocation8 + $0xa20] sm:$0xff] }
 0x234   :  { %v2577_v48 = vpack.c.bf16 %v1007_v40, %v999_v35  ;;  %v2451_v25 = vpack.c.bf16 %v1004_v45, %v996_v44  ;;  %v1070_v35 = vld [vmem:[#allocation8 + $0xc70] sm:$0xff]  ;;  %v1077_v40 = vld [vmem:[#allocation8 + $0xca8] sm:$0xff] }
 0x235   :  { %2432 = vmatpush1.bf16.msra.mxu0 %v2431_v51  ;;  %v1021_v51 = vld [vmem:[#allocation8 + $0xae8] sm:$0xff]  ;;  %v2595_v45 = vpack.c.bf16 %v1070_v35, %v1062_v33  ;;  %v1148_v35 = vld [vmem:[#allocation8 + $0xee0] sm:$0xff] }
 0x236   :  { %2560 = vmatpush1.bf16.msra.mxu1 %v2559_v52  ;;  %2434 = vmatprep.subr.bf16.mxu0 %v2433_v53  ;;  %v1015_v52 = vld [vmem:[#allocation8 + $0xab8] sm:$0xff] }
 0x237   :  { %2562 = vmatprep.subr.bf16.mxu1 %v2561_v56  ;;  %v1023_v53 = vld [vmem:[#allocation8 + $0xaf8] sm:$0xff]  ;;  %v2453_v56 = vpack.c.bf16 %v1021_v51, %v1013_v50  ;;  %v1078_v50 = vld [vmem:[#allocation8 + $0xcb0] sm:$0xff] }
 0x238   :  { %1575 = vmatmul.mubr.f32.vlgmr.msra.gmra.mrb[4].mxu0 %v2944_v22  ;;  %v2581_v62 = vpack.c.bf16 %v1023_v53, %v1015_v52  ;;  %v1086_v52 = vld [vmem:[#allocation8 + $0xcf0] sm:$0xff]  ;;  %v1093_v53 = vld [vmem:[#allocation8 + $0xd28] sm:$0xff] }
 0x239   :  { %1717 = vmatmul.mubr.f32.vlgmr.msra.gmra.mrb[4].mxu1 %v2944_v22  ;;  %2436 = vmatpush1.bf16.msra.mxu0 %v2435_v63  ;;  %v991_v22 = vld [vmem:[#allocation8 + $0x9f8] sm:$0xff]  ;;  %v1022_v63 = vld [vmem:[#allocation8 + $0xaf0] sm:$0xff]  ;;  %v2599_v59 = vpack.c.bf16 %v1086_v52, %v1078_v50  ;;  %v1164_v52 = vld [vmem:[#allocation8 + $0xf60] sm:$0xff] }
 0x23a   :  { %1645 = vmatprep.mubr.f32.mxu0 %v2948_v7  ;;  %2564 = vmatpush1.bf16.msra.mxu1 %v2563_v1  ;;  %v2573_v46 = vpack.c.bf16 %v991_v22, %v983_v24  ;;  %v1031_v1 = vld [vmem:[#allocation8 + $0xb38] sm:$0xff]  ;;  %v2583_v4 = vpack.c.bf16 %v1022_v63, %v1014_v60  ;;  %v1054_v24 = vld [vmem:[#allocation8 + $0xbf0] sm:$0xff]  ;;  %v1061_v22 = vld [vmem:[#allocation8 + $0xc28] sm:$0xff] }
 0x23b   :  { %1787 = vmatprep.mubr.f32.mxu1 %v2948_v7  ;;  %2438 = vmatprep.subr.bf16.mxu0 %v2437_v5  ;;  %v990_v7 = vld [vmem:[#allocation8 + $0x9f0] sm:$0xff]  ;;  %v2457_v5 = vpack.c.bf16 %v1037_v57, %v1029_v0  ;;  %v2591_v30 = vpack.c.bf16 %v1054_v24, %v1046_v21  ;;  %v1100_v63 = vld [vmem:[#allocation8 + $0xd60] sm:$0xff] }
 0x23c   :  { %2566 = vmatprep.subr.bf16.mxu1 %v2565_v10  ;;  %v2575_v42 = vpack.c.bf16 %v990_v7, %v982_v31  ;;  %v2585_v10 = vpack.c.bf16 %v1039_v2, %v1031_v1  ;;  %v1068_v7 = vld [vmem:[#allocation8 + $0xc60] sm:$0xff]  ;;  %v1094_v0 = vld [vmem:[#allocation8 + $0xd30] sm:$0xff]  ;;  %v1109_v2 = vld [vmem:[#allocation8 + $0xda8] sm:$0xff] }
 0x23d   :  { %2440 = vmatpush1.bf16.msra.mxu0 %v2439_v14  ;;  %v1053_v14 = vld [vmem:[#allocation8 + $0xbe8] sm:$0xff]  ;;  %v1102_v1 = vld [vmem:[#allocation8 + $0xd70] sm:$0xff]  ;;  %v1132_v24 = vld [vmem:[#allocation8 + $0xe60] sm:$0xff] }
 0x23e   :  { %2568 = vmatpush1.bf16.msra.mxu1 %v2567_v15  ;;  %2442 = vmatprep.subr.bf16.mxu0 %v2441_v16  ;;  %v1047_v15 = vld [vmem:[#allocation8 + $0xbb8] sm:$0xff]  ;;  %v2461_v19 = vpack.c.bf16 %v1053_v14, %v1045_v13  ;;  %v2603_v8 = vpack.c.bf16 %v1102_v1, %v1094_v0  ;;  %v1110_v13 = vld [vmem:[#allocation8 + $0xdb0] sm:$0xff]  ;;  %v1180_v1 = vld [vmem:[#allocation8 + $0xfe0] sm:$0xff] }
 0x23f   :  { %2570 = vmatprep.subr.bf16.mxu1 %v2569_v20  ;;  %v1055_v16 = vld [vmem:[#allocation8 + $0xbf8] sm:$0xff]  ;;  %v1044_v20 = vld [vmem:[#allocation8 + $0xba0] sm:$0xff] }
 0x240   :  { %v2589_v23 = vpack.c.bf16 %v1055_v16, %v1047_v15  ;;  %v2463_v29 = vpack.c.bf16 %v1052_v37, %v1044_v20  ;;  %v1118_v15 = vld [vmem:[#allocation8 + $0xdf0] sm:$0xff]  ;;  %v1125_v16 = vld [vmem:[#allocation8 + $0xe28] sm:$0xff] }
 0x241   :  { %2444 = vmatpush1.bf16.msra.mxu0 %v2443_v26  ;;  %v1069_v26 = vld [vmem:[#allocation8 + $0xc68] sm:$0xff]  ;;  %v2607_v37 = vpack.c.bf16 %v1118_v15, %v1110_v13 }
 0x242   :  { %2572 = vmatpush1.bf16.msra.mxu1 %v2571_v27  ;;  %2446 = vmatprep.subr.bf16.mxu0 %v2445_v28  ;;  %v1063_v27 = vld [vmem:[#allocation8 + $0xc38] sm:$0xff]  ;;  %v2465_v31 = vpack.c.bf16 %v1069_v26, %v1061_v22  ;;  %v1126_v22 = vld [vmem:[#allocation8 + $0xe30] sm:$0xff] }
 0x243   :  { %2574 = vmatprep.subr.bf16.mxu1 %v2573_v46  ;;  %v1071_v28 = vld [vmem:[#allocation8 + $0xc78] sm:$0xff]  ;;  %v1060_v46 = vld [vmem:[#allocation8 + $0xc20] sm:$0xff] }
 0x244   :  { %v2593_v34 = vpack.c.bf16 %v1071_v28, %v1063_v27  ;;  %v2467_v44 = vpack.c.bf16 %v1068_v7, %v1060_v46  ;;  %v1134_v27 = vld [vmem:[#allocation8 + $0xe70] sm:$0xff]  ;;  %v1141_v28 = vld [vmem:[#allocation8 + $0xea8] sm:$0xff] }
 0x245   :  { %2448 = vmatpush1.bf16.msra.mxu0 %v2447_v41  ;;  %v1085_v41 = vld [vmem:[#allocation8 + $0xce8] sm:$0xff]  ;;  %v2611_v7 = vpack.c.bf16 %v1134_v27, %v1126_v22  ;;  %v1216_v22 = vsub.s32 7, %v2902_v61 }
 0x246   :  { %2576 = vmatpush1.bf16.msra.mxu1 %v2575_v42  ;;  %2450 = vmatprep.subr.bf16.mxu0 %v2449_v43  ;;  %v1079_v42 = vld [vmem:[#allocation8 + $0xcb8] sm:$0xff]  ;;  %v2469_v47 = vpack.c.bf16 %v1085_v41, %v1077_v40  ;;  %v1142_v40 = vld [vmem:[#allocation8 + $0xeb0] sm:$0xff] }
 0x247   :  { %2578 = vmatprep.subr.bf16.mxu1 %v2577_v48  ;;  %v1087_v43 = vld [vmem:[#allocation8 + $0xcf8] sm:$0xff]  ;;  %v1076_v48 = vld [vmem:[#allocation8 + $0xca0] sm:$0xff] }
 0x248   :  { %v2597_v51 = vpack.c.bf16 %v1087_v43, %v1079_v42  ;;  %v2471_v58 = vpack.c.bf16 %v1084_v49, %v1076_v48  ;;  %v1150_v42 = vld [vmem:[#allocation8 + $0xef0] sm:$0xff]  ;;  %v1157_v43 = vld [vmem:[#allocation8 + $0xf28] sm:$0xff] }
 0x249   :  { %2452 = vmatpush1.bf16.msra.mxu0 %v2451_v25  ;;  %v1101_v25 = vld [vmem:[#allocation8 + $0xd68] sm:$0xff]  ;;  %v2615_v49 = vpack.c.bf16 %v1150_v42, %v1142_v40 }
 0x24a   :  { %2580 = vmatpush1.bf16.msra.mxu1 %v2579_v54  ;;  %2454 = vmatprep.subr.bf16.mxu0 %v2453_v56  ;;  %v1095_v54 = vld [vmem:[#allocation8 + $0xd38] sm:$0xff]  ;;  %v2473_v60 = vpack.c.bf16 %v1101_v25, %v1093_v53  ;;  %v1158_v53 = vld [vmem:[#allocation8 + $0xf30] sm:$0xff] }
 0x24b   :  { %2582 = vmatprep.subr.bf16.mxu1 %v2581_v62  ;;  %v1103_v56 = vld [vmem:[#allocation8 + $0xd78] sm:$0xff]  ;;  %v1092_v62 = vld [vmem:[#allocation8 + $0xd20] sm:$0xff] }
 0x24c   :  { %v2601_v57 = vpack.c.bf16 %v1103_v56, %v1095_v54  ;;  %v2475_v6 = vpack.c.bf16 %v1100_v63, %v1092_v62  ;;  %v1166_v54 = vld [vmem:[#allocation8 + $0xf70] sm:$0xff]  ;;  %v1173_v56 = vld [vmem:[#allocation8 + $0xfa8] sm:$0xff] }
 0x24d   :  { %2456 = vmatpush1.bf16.msra.mxu0 %v2455_v3  ;;  %v1117_v3 = vld [vmem:[#allocation8 + $0xde8] sm:$0xff]  ;;  %v2619_v63 = vpack.c.bf16 %v1166_v54, %v1158_v53 }
 0x24e   :  { %2584 = vmatpush1.bf16.msra.mxu1 %v2583_v4  ;;  %2458 = vmatprep.subr.bf16.mxu0 %v2457_v5  ;;  %v1111_v4 = vld [vmem:[#allocation8 + $0xdb8] sm:$0xff]  ;;  %v2477_v9 = vpack.c.bf16 %v1117_v3, %v1109_v2  ;;  %v1174_v3 = vld [vmem:[#allocation8 + $0xfb0] sm:$0xff] }
 0x24f   :  { %2586 = vmatprep.subr.bf16.mxu1 %v2585_v10  ;;  %v1119_v5 = vld [vmem:[#allocation8 + $0xdf8] sm:$0xff]  ;;  %v1108_v10 = vld [vmem:[#allocation8 + $0xda0] sm:$0xff] }
 0x250   :  { %v2605_v14 = vpack.c.bf16 %v1119_v5, %v1111_v4  ;;  %v2479_v20 = vpack.c.bf16 %v1116_v12, %v1108_v10  ;;  %v1182_v4 = vld [vmem:[#allocation8 + $0xff0] sm:$0xff] }
 0x251   :  { %2460 = vmatpush1.bf16.msra.mxu0 %v2459_v17  ;;  %v1133_v17 = vld [vmem:[#allocation8 + $0xe68] sm:$0xff] }
 0x252   :  { %2588 = vmatpush1.bf16.msra.mxu1 %v2587_v18  ;;  %2462 = vmatprep.subr.bf16.mxu0 %v2461_v19  ;;  %v1127_v18 = vld [vmem:[#allocation8 + $0xe38] sm:$0xff]  ;;  %v2481_v21 = vpack.c.bf16 %v1133_v17, %v1125_v16 }
 0x253   :  { %2590 = vmatprep.subr.bf16.mxu1 %v2589_v23  ;;  %v1135_v19 = vld [vmem:[#allocation8 + $0xe78] sm:$0xff]  ;;  %v1124_v23 = vld [vmem:[#allocation8 + $0xe20] sm:$0xff] }
 0x254   :  { %v2609_v26 = vpack.c.bf16 %v1135_v19, %v1127_v18  ;;  %v2483_v46 = vpack.c.bf16 %v1132_v24, %v1124_v23  ;;  %v1208_v24 = vsub.s32 5, %v2902_v61 }
 0x255   :  { %2464 = vmatpush1.bf16.msra.mxu0 %v2463_v29  ;;  %v1149_v29 = vld [vmem:[#allocation8 + $0xee8] sm:$0xff] }
 0x256   :  { %2592 = vmatpush1.bf16.msra.mxu1 %v2591_v30  ;;  %2466 = vmatprep.subr.bf16.mxu0 %v2465_v31  ;;  %v1143_v30 = vld [vmem:[#allocation8 + $0xeb8] sm:$0xff]  ;;  %v2485_v33 = vpack.c.bf16 %v1149_v29, %v1141_v28 }
 0x257   :  { %2594 = vmatprep.subr.bf16.mxu1 %v2593_v34  ;;  %v1151_v31 = vld [vmem:[#allocation8 + $0xef8] sm:$0xff]  ;;  %v1140_v34 = vld [vmem:[#allocation8 + $0xea0] sm:$0xff] }
 0x258   :  { %v2613_v41 = vpack.c.bf16 %v1151_v31, %v1143_v30  ;;  %v2487_v48 = vpack.c.bf16 %v1148_v35, %v1140_v34 }
 0x259   :  { %2468 = vmatpush1.bf16.msra.mxu0 %v2467_v44  ;;  %v1165_v44 = vld [vmem:[#allocation8 + $0xf68] sm:$0xff] }
 0x25a   :  { %2596 = vmatpush1.bf16.msra.mxu1 %v2595_v45  ;;  %2470 = vmatprep.subr.bf16.mxu0 %v2469_v47  ;;  %v1159_v45 = vld [vmem:[#allocation8 + $0xf38] sm:$0xff]  ;;  %v2489_v50 = vpack.c.bf16 %v1165_v44, %v1157_v43 }
 0x25b   :  { %2598 = vmatprep.subr.bf16.mxu1 %v2597_v51  ;;  %v1167_v47 = vld [vmem:[#allocation8 + $0xf78] sm:$0xff]  ;;  %v1156_v51 = vld [vmem:[#allocation8 + $0xf20] sm:$0xff] }
 0x25c   :  { %v2617_v25 = vpack.c.bf16 %v1167_v47, %v1159_v45  ;;  %v2491_v62 = vpack.c.bf16 %v1164_v52, %v1156_v51 }
 0x25d   :  { %2472 = vmatpush1.bf16.msra.mxu0 %v2471_v58  ;;  %v1181_v58 = vld [vmem:[#allocation8 + $0xfe8] sm:$0xff] }
 0x25e   :  { %2600 = vmatpush1.bf16.msra.mxu1 %v2599_v59  ;;  %2474 = vmatprep.subr.bf16.mxu0 %v2473_v60  ;;  %v1175_v59 = vld [vmem:[#allocation8 + $0xfb8] sm:$0xff]  ;;  %v2493_v0 = vpack.c.bf16 %v1181_v58, %v1173_v56 }
 0x25f   :  { %2602 = vmatprep.subr.bf16.mxu1 %v2601_v57  ;;  %v1183_v60 = vld [vmem:[#allocation8 + $0xff8] sm:$0xff]  ;;  %v1172_v57 = vld [vmem:[#allocation8 + $0xfa0] sm:$0xff] }
 0x260   :  { %v2621_v2 = vpack.c.bf16 %v1183_v60, %v1175_v59  ;;  %v2495_v5 = vpack.c.bf16 %v1180_v1, %v1172_v57 }
 0x261   :  { %2476 = vmatpush1.bf16.msra.mxu0 %v2475_v6  ;;  %v2623_v6 = vpack.c.bf16 %v1182_v4, %v1174_v3 }
 0x262   :  { %2604 = vmatpush1.bf16.msra.mxu1 %v2603_v8  ;;  %2478 = vmatprep.subr.bf16.mxu0 %v2477_v9  ;;  %v1184_v8 = vld [vmem:[#allocation10] sm:$0xff] }
 0x263   :  { %2606 = vmatprep.subr.bf16.mxu1 %v2605_v14  ;;  %v1189_v9 = vrot.slane %v1184_v8, %v344_v36  ;;  %v1197_v10 = vrot.slane %v1184_v8, %v352_v55  ;;  %v1193_v12 = vrot.slane %v1184_v8, %v348_v38  ;;  %v1201_v13 = vrot.slane %v1184_v8, %v356_v39 }
 0x264   :  { %v1204_v38 = vsub.s32 4, %v2902_v61  ;;  %v1212_v39 = vsub.s32 6, %v2902_v61  ;;  %v1209_v28 = vrot.slane %v1184_v8, %v1208_v24  ;;  %v1217_v29 = vrot.slane %v1184_v8, %v1216_v22 }
 0x265   :  { %2480 = vmatpush1.bf16.msra.mxu0 %v2479_v20 }
 0x266   :  { %2608 = vmatpush1.bf16.msra.mxu1 %v2607_v37  ;;  %2482 = vmatprep.subr.bf16.mxu0 %v2481_v21  ;;  %v1213_v27 = vrot.slane %v1184_v8, %v1212_v39 }
 0x267   :  { %2610 = vmatprep.subr.bf16.mxu1 %v2609_v26  ;;  %v1205_v26 = vrot.slane %v1184_v8, %v1204_v38 }
 0x269   :  { %2484 = vmatpush1.bf16.msra.mxu0 %v2483_v46 }
 0x26a   :  { %2612 = vmatpush1.bf16.msra.mxu1 %v2611_v7  ;;  %2486 = vmatprep.subr.bf16.mxu0 %v2485_v33 }
 0x26b   :  { %2614 = vmatprep.subr.bf16.mxu1 %v2613_v41 }
 0x26d   :  { %2488 = vmatpush1.bf16.msra.mxu0 %v2487_v48 }
 0x26e   :  { %2616 = vmatpush1.bf16.msra.mxu1 %v2615_v49  ;;  %2490 = vmatprep.subr.bf16.mxu0 %v2489_v50 }
 0x26f   :  { %2618 = vmatprep.subr.bf16.mxu1 %v2617_v25 }
 0x271   :  { %2492 = vmatpush1.bf16.msra.mxu0 %v2491_v62 }
 0x272   :  { %2620 = vmatpush1.bf16.msra.mxu1 %v2619_v63  ;;  %2494 = vmatprep.subr.bf16.mxu0 %v2493_v0 }
 0x273   :  { %2622 = vmatprep.subr.bf16.mxu1 %v2621_v2 }
 0x275   :  { %2496 = vmatpush1.bf16.msra.mxu0 %v2495_v5 }
 0x276   :  { %2624 = vmatpush1.bf16.msra.mxu1 %v2623_v6 }
 0x278   :  { %1646 = vmatmul.mubr.f32.vlgmr.msra.gmra.mrb[4].mxu0 %v2959_v32 }
 0x279   :  { %1788 = vmatmul.mubr.f32.vlgmr.msra.gmra.mrb[4].mxu1 %v2959_v32 }
 0x2cb   :  { %v1363_v14 = vpop.f32.mrb[2].mxu0  ;;  %v1505_v15 = vpop.f32.mrb[2].mxu1 }
 0x2cc   :  { %v2629_v16 = vadd.f32 %v1363_v14, %v1189_v9  ;;  %v2631_v17 = vadd.f32 %v1505_v15, %v1197_v10  ;;  %v1365_v18 = vpop.f32.mrb[3].mxu0  ;;  %v1507_v19 = vpop.f32.mrb[3].mxu1 }
 0x2cd   :  { %v2630_v32 = vadd.f32 %v1365_v18, %v1193_v12  ;;  %v2632_v20 = vadd.f32 %v1507_v19, %v1201_v13 }
 0x2cf   :  { %v1802_v37 = vcombine.low %v2629_v16, %v2630_v32  ;;  %v1803_v21 = vcombine.low %v2631_v17, %v2632_v20 }
 0x2d1   :  { %v1810_v36 = vrot.slane %v1802_v37, %v2905_v11  ;;  %v1817_v55 = vrot.slane %v1803_v21, %v2905_v11 }
 0x2d3   :  { %v1818_v23 = vcombine.low %v1810_v36, %v1817_v55 }
 0x2d5   :  { %1838 = vst [vmem:[#allocation11] sm:$0xff] %v1818_v23 }
 0x34b   :  { %v1647_v30 = vpop.f32.mrb[4].mxu0 }
 0x34c   :  { %v2633_v31 = vadd.f32 %v1647_v30, %v1205_v26  ;;  %v1789_v46 = vpop.f32.mrb[4].mxu1  ;;  %v1649_v7 = vpop.f32.mrb[5].mxu0 }
 0x34d   :  { %v2635_v33 = vadd.f32 %v1789_v46, %v1213_v27  ;;  %v2634_v34 = vadd.f32 %v1649_v7, %v1209_v28  ;;  %v1791_v35 = vpop.f32.mrb[5].mxu1 }
 0x34e   :  { %v2636_v40 = vadd.f32 %v1791_v35, %v1217_v29 }
 0x34f   :  { %v1819_v41 = vcombine.low %v2633_v31, %v2634_v34 }
 0x350   :  { %v1820_v42 = vcombine.low %v2635_v33, %v2636_v40 }
 0x351   :  { %v1827_v43 = vrot.slane %v1819_v41, %v2905_v11 }
 0x352   :  { %v1834_v61 = vrot.slane %v1820_v42, %v2905_v11 }
 0x354   :  { %v1835_v44 = vcombine.low %v1827_v43, %v1834_v61 }
 0x356   :  { %1839 = vst [vmem:[#allocation11 + $0x8] sm:$0xff] %v1835_v44 }
 0x357   :  { %2782 = shalt.err (!%p2779_p2)
}
 0x358   :  { %s2783_s3 = scalar_lea.hbm %s3004_s5, 256 }
 0x359   :  { %p2784_p3 = scmp.ne.s32.totalorder %s3004_s5, %s2783_s3  ;;  %p2787_p4 = scmp.lt.u32.totalorder %s2783_s3, %s3004_s5 }
 0x35b   :  { %p2789_p5 = pnand %p2787_p4, %p2784_p3 }
 0x35d   :  { %2792 = shalt.err (!%p2789_p5)
}
 0x35e   :  { %1849 = dma.vmem_to_hbm [thread:$0]  %s1847_s27, 256, %s3004_s5, [#allocation4]  }
 0x35f   :  { %2799 = dma.done.wait [#allocation4], 256  }
 0x360   :  { %2800 = vsyncadd [#allocation4], 4294967040 }
 0x361   :  { %1853 = vsyncpa [#allocation3], 1 }
 0x362   :  { %1854 = vsyncpa [#allocation6], 1 }
 0x363   :  { %1855 = vsyncpa [#allocation9], 1 }
 0x364   :  { %1856 = vsyncpa [#allocation4], 1 }

</bundles_post_ra>
